<compile_context>
chip_gen: v5e
topology: v5e:2x2
jax: 0.10.0
libtpu: 0.0.40
codegen_flags: <defaults>
</compile_context>

<pallas_src>
import functools
import math

import numpy as np
import jax
import jax.numpy as jnp
from jax import lax
from jax.experimental import pallas as pl
from jax.experimental.pallas import tpu as pltpu


def _bilinear_matrix_np(in_size: int, out_size: int) -> np.ndarray:
    """(out_size, in_size) 1-D bilinear interpolation matrix, align_corners=True."""
    U = np.zeros((out_size, in_size), dtype=np.float32)
    if out_size == 1 or in_size == 1:
        U[:, 0] = 1.0
        return U
    scale = (in_size - 1) / (out_size - 1)
    for i in range(out_size):
        src = i * scale
        y0 = min(int(math.floor(src)), in_size - 1)
        y1 = min(y0 + 1, in_size - 1)
        t = src - y0
        U[i, y0] += 1.0 - t
        U[i, y1] += t
    return U


def _border_masks_np(H2: int, W2: int) -> np.ndarray:
    """(9, 1, S) masks: mask[t, 0, h2*W2 + w2] = 1 iff the tap-t neighbour of
    output position (h2, w2) lies inside the (H2, W2) image (zero padding)."""
    S = H2 * W2
    hpos = np.arange(S) // W2
    wpos = np.arange(S) % W2
    masks = np.zeros((9, 1, S), dtype=np.float32)
    for dy in range(3):
        for dx in range(3):
            oy, ox = dy - 1, dx - 1
            ok = ((wpos + ox >= 0) & (wpos + ox < W2) &
                  (hpos + oy >= 0) & (hpos + oy < H2))
            masks[dy * 3 + dx, 0, :] = ok.astype(np.float32)
    return masks


def _fused_kernel(x_ref, m_ref, w_ref, mask_ref, shift_ref, out_ref, col_ref,
                  *, W2, S, Cin_p):
    """Fused bilinear-upsample + 3x3 conv + BN(inference) + ReLU for one image.

    x_ref:    (1, Cin_p, H*W)   channel-padded, flattened-spatial input
    m_ref:    (H*W, S)          kron(Uh^T, Uw^T) upsample operator, S = H2*W2
    w_ref:    (Cout, 9*Cin_p)   BN-scale-folded conv weights, [co, t*Cin_p + ci]
    mask_ref: (9, 1, S)         per-tap border masks (zero padding)
    shift_ref:(Cout, 1)         folded conv-bias + BatchNorm shift
    out_ref:  (1, Cout, S)      lane-dense output block
    col_ref:  (9*Cin_p, S)      im2col VMEM scratch
    """
    # Bilinear upsample (align_corners=True): one MXU matmul whose result is
    # already lane-dense flattened spatial.  The channel concat happened on the
    # (tiny) input side in the wrapper.
    u = jnp.dot(x_ref[0], m_ref[...],
                preferred_element_type=jnp.float32)          # (Cin_p, S)

    # im2col: each 3x3 tap is a lane roll (XLU) + one multiply against its
    # precomputed border mask, stored to an aligned 8-row block of the scratch.
    for dy in range(3):
        for dx in range(3):
            t = dy * 3 + dx
            delta = (dy - 1) * W2 + (dx - 1)   # flattened neighbour offset
            if delta == 0:
                tap = u                        # centre tap: always in bounds
            else:
                tap = pltpu.roll(u, shift=(-delta) % S, axis=1) * mask_ref[t]
            col_ref[t * Cin_p:(t + 1) * Cin_p, :] = tap

    # 3x3 conv (+ folded BN scale) as ONE matmul with K = 9*Cin_p; epilogue is
    # a per-channel shift + ReLU; the (Cout, S) store is unmasked lane-dense.
    acc = jnp.dot(w_ref[...], col_ref[...],
                  preferred_element_type=jnp.float32)        # (Cout, S)
    out_ref[0] = jnp.maximum(acc + shift_ref[...], 0.0).astype(out_ref.dtype)


def init_upsample_concat(key, in_planes, out_planes):
    """Deterministic parameter init mirroring nn.Conv2d + nn.BatchNorm2d shapes."""
    k_w, k_b, k_g, k_be, k_m, k_v = jax.random.split(key, 6)
    fan_in = in_planes * 9
    bound = 1.0 / math.sqrt(fan_in)
    params = dict(
        conv_w=jax.random.uniform(k_w, (out_planes, in_planes, 3, 3),
                                  jnp.float32, -bound, bound),   # OIHW
        conv_b=jax.random.uniform(k_b, (out_planes,), jnp.float32, -bound, bound),
        bn_gamma=1.0 + 0.1 * jax.random.normal(k_g, (out_planes,), jnp.float32),
        bn_beta=0.1 * jax.random.normal(k_be, (out_planes,), jnp.float32),
        bn_mean=0.1 * jax.random.normal(k_m, (out_planes,), jnp.float32),
        bn_var=jnp.abs(jax.random.normal(k_v, (out_planes,), jnp.float32)) + 0.5,
        bn_eps=1e-5,
    )
    return params


def upsample_concat_forward(params, x1_nchw, x2_nchw, scale_factor=2):
    N, C1, H, W = x1_nchw.shape
    C2 = x2_nchw.shape[1]
    Cin = C1 + C2
    H2, W2 = H * scale_factor, W * scale_factor
    HW, S = H * W, H2 * W2
    Cout = params["conv_w"].shape[0]
    Cin_p = ((Cin + 7) // 8) * 8           # pad channels to a full sublane tile

    # Channel concat + zero pad + spatial flatten: all on the small pre-upsample
    # input (a few KB), everything downstream stays inside one fused kernel.
    x = jnp.concatenate([x1_nchw, x2_nchw], axis=1).astype(jnp.float32)
    if Cin_p != Cin:
        x = jnp.concatenate(
            [x, jnp.zeros((N, Cin_p - Cin, H, W), jnp.float32)], axis=1)
    x_flat = x.reshape(N, Cin_p, HW)

    # Host-precomputed separable-bilinear operator in flattened-spatial form:
    # up_flat = x_flat @ kron(Uh^T, Uw^T), shape (H*W, H2*W2).
    Uh = _bilinear_matrix_np(H, H2)        # (H2, H)
    Uw = _bilinear_matrix_np(W, W2)        # (W2, W)
    M = jnp.asarray(np.kron(Uh.T, Uw.T).astype(np.float32))       # (HW, S)

    # Fold conv bias + inference BatchNorm: scale goes into the weights,
    # shift stays as a per-Cout additive epilogue.
    inv_std = 1.0 / jnp.sqrt(params["bn_var"] + params["bn_eps"])
    s = params["bn_gamma"] * inv_std                               # (Cout,)
    shift = (params["conv_b"] - params["bn_mean"]) * s + params["bn_beta"]
    w_scaled = params["conv_w"] * s[:, None, None, None]           # (Cout,Cin,3,3)
    w_tap = jnp.transpose(w_scaled, (0, 2, 3, 1))                  # (Cout,3,3,Cin)
    if Cin_p != Cin:
        w_tap = jnp.pad(w_tap, ((0, 0), (0, 0), (0, 0), (0, Cin_p - Cin)))
    w2d = w_tap.reshape(Cout, 9 * Cin_p)       # w2d[co, t*Cin_p + ci]
    shift_c = shift.reshape(Cout, 1)

    mask9 = jnp.asarray(_border_masks_np(H2, W2))                  # (9, 1, S)

    kernel = functools.partial(_fused_kernel, W2=W2, S=S, Cin_p=Cin_p)

    out_flat = pl.pallas_call(
        kernel,
        out_shape=jax.ShapeDtypeStruct((N, Cout, S), jnp.float32),
        grid_spec=pltpu.PrefetchScalarGridSpec(
            num_scalar_prefetch=0,
            grid=(N,),
            in_specs=[
                pl.BlockSpec((1, Cin_p, HW), lambda n: (n, 0, 0)),
                pl.BlockSpec((HW, S), lambda n: (0, 0)),
                pl.BlockSpec((Cout, 9 * Cin_p), lambda n: (0, 0)),
                pl.BlockSpec((9, 1, S), lambda n: (0, 0, 0)),
                pl.BlockSpec((Cout, 1), lambda n: (0, 0)),
            ],
            out_specs=pl.BlockSpec((1, Cout, S), lambda n: (n, 0, 0)),
            scratch_shapes=[pltpu.VMEM((9 * Cin_p, S), jnp.float32)],
        ),
        compiler_params=pltpu.CompilerParams(
            dimension_semantics=("parallel",)),
    )(x_flat, M, w2d, mask9, shift_c)

    # Final logical reshape back to NCHW for the caller.
    return out_flat.reshape(N, Cout, H2, W2)


def reference_forward(params, x1_nchw, x2_nchw, scale_factor=2):
    """Plain-JAX reference with identical math (bilinear align_corners=True)."""
    x = jnp.concatenate([x1_nchw, x2_nchw], axis=1)
    x = jnp.transpose(x, (0, 2, 3, 1)).astype(jnp.float32)
    N, H, W, Cin = x.shape
    H2, W2 = H * scale_factor, W * scale_factor
    Uh = jnp.asarray(_bilinear_matrix_np(H, H2))
    Uw = jnp.asarray(_bilinear_matrix_np(W, W2))
    up = jnp.einsum("oh,pw,nhwc->nopc", Uh, Uw, x)
    w_hwio = jnp.transpose(params["conv_w"], (2, 3, 1, 0))
    conv = lax.conv_general_dilated(
        up, w_hwio, window_strides=(1, 1), padding="SAME",
        dimension_numbers=("NHWC", "HWIO", "NHWC"),
    ) + params["conv_b"]
    inv_std = 1.0 / jnp.sqrt(params["bn_var"] + params["bn_eps"])
    bn = (conv - params["bn_mean"]) * inv_std * params["bn_gamma"] + params["bn_beta"]
    out = jnp.maximum(bn, 0.0)
    return jnp.transpose(out, (0, 3, 1, 2))


if __name__ == "__main__":
    key = jax.random.PRNGKey(0)
    k1, k2, kp = jax.random.split(key, 3)

    N, C1, C2, H, W = 2, 2, 2, 16, 16
    in_planes, out_planes = C1 + C2, 8

    x1 = jax.random.normal(k1, (N, C1, H, W), jnp.float32)
    x2 = jax.random.normal(k2, (N, C2, H, W), jnp.float32)
    params = init_upsample_concat(kp, in_planes, out_planes)

    out = upsample_concat_forward(params, x1, x2, scale_factor=2)
    out = jax.block_until_ready(out)

    ref = jax.block_until_ready(reference_forward(params, x1, x2, scale_factor=2))
    assert out.shape == (N, out_planes, 2 * H, 2 * W), out.shape
    np.testing.assert_allclose(np.asarray(out), np.asarray(ref),
                               rtol=1e-4, atol=1e-4)
    print("KERNEL_OK")
</pallas_src>

<mosaic_0001>
module attributes {stable_mosaic.version = 11 : i64} {
  func.func @_fused_kernel(%arg0: i32, %arg1: memref<1x8x256xf32, #tpu.memory_space<vmem>>, %arg2: memref<256x1024xf32, #tpu.memory_space<vmem>>, %arg3: memref<8x72xf32, #tpu.memory_space<vmem>>, %arg4: memref<9x1x1024xf32, #tpu.memory_space<vmem>>, %arg5: memref<8x1xf32, #tpu.memory_space<vmem>>, %arg6: memref<1x8x1024xf32, #tpu.memory_space<vmem>>, %arg7: memref<72x1024xf32, #tpu.memory_space<vmem>>) attributes {dimension_semantics = [#tpu.dimension_semantics<parallel>], iteration_bounds = array<i64: 2>, scalar_prefetch = 0 : i64, scratch_operands = 1 : i64, tpu.core_type = #tpu.core_type<tc>, window_params = [{transform_indices = @transform_0, window_bounds = array<i64: 1, 8, 256>}, {pipeline_mode = #tpu.pipeline_mode<synchronous>, transform_indices = @transform_1, window_bounds = array<i64: 256, 1024>}, {pipeline_mode = #tpu.pipeline_mode<synchronous>, transform_indices = @transform_2, window_bounds = array<i64: 8, 72>}, {pipeline_mode = #tpu.pipeline_mode<synchronous>, transform_indices = @transform_3, window_bounds = array<i64: 9, 1, 1024>}, {pipeline_mode = #tpu.pipeline_mode<synchronous>, transform_indices = @transform_4, window_bounds = array<i64: 8, 1>}, {transform_indices = @transform_5, window_bounds = array<i64: 1, 8, 1024>}]} {
    %c0 = arith.constant 0 : index
    %c0_0 = arith.constant 0 : index
    %c0_1 = arith.constant 0 : index
    %0 = vector.load %arg1[%c0, %c0_0, %c0_1] : memref<1x8x256xf32, #tpu.memory_space<vmem>>, vector<1x8x256xf32>
    %1 = vector.shape_cast %0 : vector<1x8x256xf32> to vector<8x256xf32>
    %c0_2 = arith.constant 0 : index
    %c0_3 = arith.constant 0 : index
    %2 = vector.load %arg2[%c0_2, %c0_3] : memref<256x1024xf32, #tpu.memory_space<vmem>>, vector<256x1024xf32>
    %cst = arith.constant dense<0.000000e+00> : vector<8x1024xf32>
    %3 = tpu.matmul %1, %2, %cst {dimension_numbers = #tpu.dot_dimension_numbers<[1], [0], [0], [1], [0, 0, 1, 1], [], []>} : vector<8x256xf32>, vector<256x1024xf32>, vector<8x1024xf32> -> vector<8x1024xf32>
    %c33_i32 = arith.constant 33 : i32
    %4 = tpu.dynamic_rotate %3 by %c33_i32 dim 1 : vector<8x1024xf32>, i32 -> vector<8x1024xf32>
    %c0_4 = arith.constant 0 : index
    %c0_5 = arith.constant 0 : index
    %c0_6 = arith.constant 0 : index
    %5 = vector.load %arg4[%c0_4, %c0_5, %c0_6] : memref<9x1x1024xf32, #tpu.memory_space<vmem>>, vector<1x1x1024xf32>
    %6 = vector.shape_cast %5 : vector<1x1x1024xf32> to vector<1x1024xf32>
    %7 = vector.broadcast %6 : vector<1x1024xf32> to vector<8x1024xf32>
    %8 = arith.mulf %4, %7 : vector<8x1024xf32>
    %c0_7 = arith.constant 0 : index
    %c0_8 = arith.constant 0 : index
    %9 = vector.load %arg7[%c0_7, %c0_8] : memref<72x1024xf32, #tpu.memory_space<vmem>>, vector<8x1024xf32>
    tpu.vector_store %arg7[%c0_7, %c0_8], %8 {strides = array<i32>} : memref<72x1024xf32, #tpu.memory_space<vmem>>, vector<8x1024xf32>,
    %c32_i32 = arith.constant 32 : i32
    %10 = tpu.dynamic_rotate %3 by %c32_i32 dim 1 : vector<8x1024xf32>, i32 -> vector<8x1024xf32>
    %c1 = arith.constant 1 : index
    %c0_9 = arith.constant 0 : index
    %c0_10 = arith.constant 0 : index
    %11 = vector.load %arg4[%c1, %c0_9, %c0_10] : memref<9x1x1024xf32, #tpu.memory_space<vmem>>, vector<1x1x1024xf32>
    %12 = vector.shape_cast %11 : vector<1x1x1024xf32> to vector<1x1024xf32>
    %13 = vector.broadcast %12 : vector<1x1024xf32> to vector<8x1024xf32>
    %14 = arith.mulf %10, %13 : vector<8x1024xf32>
    %c8 = arith.constant 8 : index
    %c0_11 = arith.constant 0 : index
    %15 = vector.load %arg7[%c8, %c0_11] : memref<72x1024xf32, #tpu.memory_space<vmem>>, vector<8x1024xf32>
    tpu.vector_store %arg7[%c8, %c0_11], %14 {strides = array<i32>} : memref<72x1024xf32, #tpu.memory_space<vmem>>, vector<8x1024xf32>,
    %c31_i32 = arith.constant 31 : i32
    %16 = tpu.dynamic_rotate %3 by %c31_i32 dim 1 : vector<8x1024xf32>, i32 -> vector<8x1024xf32>
    %c2 = arith.constant 2 : index
    %c0_12 = arith.constant 0 : index
    %c0_13 = arith.constant 0 : index
    %17 = vector.load %arg4[%c2, %c0_12, %c0_13] : memref<9x1x1024xf32, #tpu.memory_space<vmem>>, vector<1x1x1024xf32>
    %18 = vector.shape_cast %17 : vector<1x1x1024xf32> to vector<1x1024xf32>
    %19 = vector.broadcast %18 : vector<1x1024xf32> to vector<8x1024xf32>
    %20 = arith.mulf %16, %19 : vector<8x1024xf32>
    %c16 = arith.constant 16 : index
    %c0_14 = arith.constant 0 : index
    %21 = vector.load %arg7[%c16, %c0_14] : memref<72x1024xf32, #tpu.memory_space<vmem>>, vector<8x1024xf32>
    tpu.vector_store %arg7[%c16, %c0_14], %20 {strides = array<i32>} : memref<72x1024xf32, #tpu.memory_space<vmem>>, vector<8x1024xf32>,
    %c1_i32 = arith.constant 1 : i32
    %22 = tpu.dynamic_rotate %3 by %c1_i32 dim 1 : vector<8x1024xf32>, i32 -> vector<8x1024xf32>
    %c3 = arith.constant 3 : index
    %c0_15 = arith.constant 0 : index
    %c0_16 = arith.constant 0 : index
    %23 = vector.load %arg4[%c3, %c0_15, %c0_16] : memref<9x1x1024xf32, #tpu.memory_space<vmem>>, vector<1x1x1024xf32>
    %24 = vector.shape_cast %23 : vector<1x1x1024xf32> to vector<1x1024xf32>
    %25 = vector.broadcast %24 : vector<1x1024xf32> to vector<8x1024xf32>
    %26 = arith.mulf %22, %25 : vector<8x1024xf32>
    %c24 = arith.constant 24 : index
    %c0_17 = arith.constant 0 : index
    %27 = vector.load %arg7[%c24, %c0_17] : memref<72x1024xf32, #tpu.memory_space<vmem>>, vector<8x1024xf32>
    tpu.vector_store %arg7[%c24, %c0_17], %26 {strides = array<i32>} : memref<72x1024xf32, #tpu.memory_space<vmem>>, vector<8x1024xf32>,
    %c32 = arith.constant 32 : index
    %c0_18 = arith.constant 0 : index
    %28 = vector.load %arg7[%c32, %c0_18] : memref<72x1024xf32, #tpu.memory_space<vmem>>, vector<8x1024xf32>
    tpu.vector_store %arg7[%c32, %c0_18], %3 {strides = array<i32>} : memref<72x1024xf32, #tpu.memory_space<vmem>>, vector<8x1024xf32>,
    %c1023_i32 = arith.constant 1023 : i32
    %29 = tpu.dynamic_rotate %3 by %c1023_i32 dim 1 : vector<8x1024xf32>, i32 -> vector<8x1024xf32>
    %c5 = arith.constant 5 : index
    %c0_19 = arith.constant 0 : index
    %c0_20 = arith.constant 0 : index
    %30 = vector.load %arg4[%c5, %c0_19, %c0_20] : memref<9x1x1024xf32, #tpu.memory_space<vmem>>, vector<1x1x1024xf32>
    %31 = vector.shape_cast %30 : vector<1x1x1024xf32> to vector<1x1024xf32>
    %32 = vector.broadcast %31 : vector<1x1024xf32> to vector<8x1024xf32>
    %33 = arith.mulf %29, %32 : vector<8x1024xf32>
    %c40 = arith.constant 40 : index
    %c0_21 = arith.constant 0 : index
    %34 = vector.load %arg7[%c40, %c0_21] : memref<72x1024xf32, #tpu.memory_space<vmem>>, vector<8x1024xf32>
    tpu.vector_store %arg7[%c40, %c0_21], %33 {strides = array<i32>} : memref<72x1024xf32, #tpu.memory_space<vmem>>, vector<8x1024xf32>,
    %c993_i32 = arith.constant 993 : i32
    %35 = tpu.dynamic_rotate %3 by %c993_i32 dim 1 : vector<8x1024xf32>, i32 -> vector<8x1024xf32>
    %c6 = arith.constant 6 : index
    %c0_22 = arith.constant 0 : index
    %c0_23 = arith.constant 0 : index
    %36 = vector.load %arg4[%c6, %c0_22, %c0_23] : memref<9x1x1024xf32, #tpu.memory_space<vmem>>, vector<1x1x1024xf32>
    %37 = vector.shape_cast %36 : vector<1x1x1024xf32> to vector<1x1024xf32>
    %38 = vector.broadcast %37 : vector<1x1024xf32> to vector<8x1024xf32>
    %39 = arith.mulf %35, %38 : vector<8x1024xf32>
    %c48 = arith.constant 48 : index
    %c0_24 = arith.constant 0 : index
    %40 = vector.load %arg7[%c48, %c0_24] : memref<72x1024xf32, #tpu.memory_space<vmem>>, vector<8x1024xf32>
    tpu.vector_store %arg7[%c48, %c0_24], %39 {strides = array<i32>} : memref<72x1024xf32, #tpu.memory_space<vmem>>, vector<8x1024xf32>,
    %c992_i32 = arith.constant 992 : i32
    %41 = tpu.dynamic_rotate %3 by %c992_i32 dim 1 : vector<8x1024xf32>, i32 -> vector<8x1024xf32>
    %c7 = arith.constant 7 : index
    %c0_25 = arith.constant 0 : index
    %c0_26 = arith.constant 0 : index
    %42 = vector.load %arg4[%c7, %c0_25, %c0_26] : memref<9x1x1024xf32, #tpu.memory_space<vmem>>, vector<1x1x1024xf32>
    %43 = vector.shape_cast %42 : vector<1x1x1024xf32> to vector<1x1024xf32>
    %44 = vector.broadcast %43 : vector<1x1024xf32> to vector<8x1024xf32>
    %45 = arith.mulf %41, %44 : vector<8x1024xf32>
    %c56 = arith.constant 56 : index
    %c0_27 = arith.constant 0 : index
    %46 = vector.load %arg7[%c56, %c0_27] : memref<72x1024xf32, #tpu.memory_space<vmem>>, vector<8x1024xf32>
    tpu.vector_store %arg7[%c56, %c0_27], %45 {strides = array<i32>} : memref<72x1024xf32, #tpu.memory_space<vmem>>, vector<8x1024xf32>,
    %c991_i32 = arith.constant 991 : i32
    %47 = tpu.dynamic_rotate %3 by %c991_i32 dim 1 : vector<8x1024xf32>, i32 -> vector<8x1024xf32>
    %c8_28 = arith.constant 8 : index
    %c0_29 = arith.constant 0 : index
    %c0_30 = arith.constant 0 : index
    %48 = vector.load %arg4[%c8_28, %c0_29, %c0_30] : memref<9x1x1024xf32, #tpu.memory_space<vmem>>, vector<1x1x1024xf32>
    %49 = vector.shape_cast %48 : vector<1x1x1024xf32> to vector<1x1024xf32>
    %50 = vector.broadcast %49 : vector<1x1024xf32> to vector<8x1024xf32>
    %51 = arith.mulf %47, %50 : vector<8x1024xf32>
    %c64 = arith.constant 64 : index
    %c0_31 = arith.constant 0 : index
    %52 = vector.load %arg7[%c64, %c0_31] : memref<72x1024xf32, #tpu.memory_space<vmem>>, vector<8x1024xf32>
    tpu.vector_store %arg7[%c64, %c0_31], %51 {strides = array<i32>} : memref<72x1024xf32, #tpu.memory_space<vmem>>, vector<8x1024xf32>,
    %c0_32 = arith.constant 0 : index
    %c0_33 = arith.constant 0 : index
    %53 = vector.load %arg3[%c0_32, %c0_33] : memref<8x72xf32, #tpu.memory_space<vmem>>, vector<8x72xf32>
    %c0_34 = arith.constant 0 : index
    %c0_35 = arith.constant 0 : index
    %54 = vector.load %arg7[%c0_34, %c0_35] : memref<72x1024xf32, #tpu.memory_space<vmem>>, vector<72x1024xf32>
    %cst_36 = arith.constant dense<0.000000e+00> : vector<8x1024xf32>
    %55 = tpu.matmul %53, %54, %cst_36 {dimension_numbers = #tpu.dot_dimension_numbers<[1], [0], [0], [1], [0, 0, 1, 1], [], []>} : vector<8x72xf32>, vector<72x1024xf32>, vector<8x1024xf32> -> vector<8x1024xf32>
    %c0_37 = arith.constant 0 : index
    %c0_38 = arith.constant 0 : index
    %56 = vector.load %arg5[%c0_37, %c0_38] : memref<8x1xf32, #tpu.memory_space<vmem>>, vector<8x1xf32>
    %57 = vector.broadcast %56 : vector<8x1xf32> to vector<8x1024xf32>
    %58 = arith.addf %55, %57 : vector<8x1024xf32>
    %cst_39 = arith.constant 0.000000e+00 : f32
    %59 = vector.broadcast %cst_39 : f32 to vector<8x1024xf32>
    %60 = arith.maximumf %58, %59 : vector<8x1024xf32>
    %c0_40 = arith.constant 0 : index
    %c0_41 = arith.constant 0 : index
    %c0_42 = arith.constant 0 : index
    %61 = vector.load %arg6[%c0_40, %c0_41, %c0_42] : memref<1x8x1024xf32, #tpu.memory_space<vmem>>, vector<1x8x1024xf32>
    %62 = vector.shape_cast %61 : vector<1x8x1024xf32> to vector<8x1024xf32>
    %63 = vector.shape_cast %60 : vector<8x1024xf32> to vector<1x8x1024xf32>
    tpu.vector_store %arg6[%c0_40, %c0_41, %c0_42], %63 {strides = array<i32>} : memref<1x8x1024xf32, #tpu.memory_space<vmem>>, vector<1x8x1024xf32>,
    return
  }
  func.func @transform_0(%arg0: i32) -> (i32, i32, i32) {
    %c0_i32 = arith.constant 0 : i32
    %c0_i32_0 = arith.constant 0 : i32
    %c0_i32_1 = arith.constant 0 : i32
    return %arg0, %c0_i32, %c0_i32_0 : i32, i32, i32
  }
  func.func @transform_1(%arg0: i32) -> (i32, i32) {
    %c0_i32 = arith.constant 0 : i32
    %c0_i32_0 = arith.constant 0 : i32
    %c0_i32_1 = arith.constant 0 : i32
    return %c0_i32, %c0_i32_0 : i32, i32
  }
  func.func @transform_2(%arg0: i32) -> (i32, i32) {
    %c0_i32 = arith.constant 0 : i32
    %c0_i32_0 = arith.constant 0 : i32
    %c0_i32_1 = arith.constant 0 : i32
    return %c0_i32, %c0_i32_0 : i32, i32
  }
  func.func @transform_3(%arg0: i32) -> (i32, i32, i32) {
    %c0_i32 = arith.constant 0 : i32
    %c0_i32_0 = arith.constant 0 : i32
    %c0_i32_1 = arith.constant 0 : i32
    %c0_i32_2 = arith.constant 0 : i32
    return %c0_i32, %c0_i32_0, %c0_i32_1 : i32, i32, i32
  }
  func.func @transform_4(%arg0: i32) -> (i32, i32) {
    %c0_i32 = arith.constant 0 : i32
    %c0_i32_0 = arith.constant 0 : i32
    %c0_i32_1 = arith.constant 0 : i32
    return %c0_i32, %c0_i32_0 : i32, i32
  }
  func.func @transform_5(%arg0: i32) -> (i32, i32, i32) {
    %c0_i32 = arith.constant 0 : i32
    %c0_i32_0 = arith.constant 0 : i32
    %c0_i32_1 = arith.constant 0 : i32
    return %arg0, %c0_i32, %c0_i32_0 : i32, i32, i32
  }
}

</mosaic_0001>

<bundles_post_ra>
// kernel: tpu_custom_call.1
= control target key start
LH: loop header
LB: loop body
LE: loop exit
PB: predicated region body
PF: predicated region fallthrough
CT: control target
= control target key end

     0   :  { %10 = vsyncpa [#allocation4], 0  ;;  %s2755_s0 = inlined_call_operand.hbm [shape: f32[2,8,256], index: 0, kind: input, shape index: {}]   ;;  %s2756_s1 = inlined_call_operand.hbm [shape: f32[256,1024], index: 1, kind: input, shape index: {}]   ;;  %s2757_s2 = inlined_call_operand.vmem [shape: f32[8,72], index: 2, kind: input, shape index: {}]   ;;  %s2758_s3 = inlined_call_operand.hbm [shape: f32[9,1,1024], index: 3, kind: input, shape index: {}]   ;;  %s2759_s4 = inlined_call_operand.vmem [shape: f32[8,1], index: 4, kind: input, shape index: {}]   ;;  %s2760_s5 = inlined_call_operand.hbm [shape: f32[2,8,1024], index: 5, kind: output, shape index: {}]  }
   0x1   :  { %12 = vsyncpa [#allocation4 + $0x1], 0 }
   0x2   :  { %13 = vsyncpa [#allocation7], 0 }
   0x3   :  { %14 = vsyncpa [#allocation5], 0 }
   0x4   :  { %16 = vsyncpa [#allocation5 + $0x1], 0  ;;  %s2025_s18 = smov 0   ;;  %s2027_s19 = smov 0  }
   0x5   :  { %s2029_s20 = smov 0   ;;  %s2031_s21 = smov 0  }
   0x6 LB: > { %s174_s24 = sshll.u32 %s2756_s1, 4  ;;  %s2049_s25 = sadd.s32 4294967295, %s1978_s21   ;;  %s1978_s21 = sphi %s2031_s21, %s2771_s21   ;;  %s1974_s20 = sphi %s2029_s20, %s2770_s20   ;;  %s1970_s19 = sphi %s2027_s19, %s2769_s19   ;;  %s1966_s18 = sphi %s2025_s18, %s2768_s18   ;;  %s175_s24 = int_to_ptr.hbm [resolvable:$true] %s174_s24 }
   0x7   : > { %p1709_p0 = scmp.ge.s32.totalorder %s1978_s21, 1  ;;  %p43_p1 = scmp.eq.s32.totalorder %s2049_s25, 0 }
   0x8   : > { %p163_p2 = scmp.lt.s32.totalorder %s1978_s21, 3  ;;  %s1980_s27 = smov [#allocation6]  }
   0x9   : > { %s176_s28 = sshll.u32 %s1980_s27, 4  ;;  %s191_s6 = sshll.u32 %s2758_s3, 4  ;;  %s177_s28 = int_to_ptr.vmem [resolvable:$true] %s176_s28  ;;  %s192_s6 = int_to_ptr.hbm [resolvable:$true] %s191_s6 }
   0xa   : > { %p2054_p3 = pnand %p1709_p0, %p163_p2  ;;  %s1981_s7 = smov [#allocation8]  }
   0xb   : > { %s193_s8 = sshll.u32 %s1981_s7, 4  ;;  %s1982_s9 = smov 1024   ;;  %s194_s8 = int_to_ptr.vmem [resolvable:$true] %s193_s8 }
   0xc   : > { %p1748_p4 = pneg %p2054_p3  ;;  %s1983_s10 = smov 64  }
   0xd   : > { %s1984_s11 = smov 128   ;;  %s1985_s12 = smov 8  }
   0xe   : > { %p1749_p6 = pnand %p1748_p4, %p43_p1  ;;  %s1708_s13 = sadd.s32 4294967294, %s1978_s21  }
   0xf   : > { %s2068_s14 = sadd.s32 1, %s1978_s21   ;;  %s29_s16 = sadd.s32 1, %s1974_s20 }
  0x10   : > { %1751 = dma.hbm_to_vmem [thread:$0]  (!%p1749_p6), %s175_s24, 32768, %s177_s28, [#allocation7], %s1982_s9, %s1982_s9, %s1983_s10  }
  0x11   : > { %1754 = dma.hbm_to_vmem [thread:$0]  (!%p1749_p6), %s192_s6, 1152, %s194_s8, [#allocation7], %s1984_s11, %s1984_s11, %s1985_s12  }
  0x12   : > { %s26_s15 = ssub.s32 %s1978_s21, %s2068_s14  ;;  %p36_p8 = scmp.ne.s32.totalorder %s1974_s20, %s1970_s19 }
  0x13   : > { %p27_p7 = scmp.eq.s32.totalorder %s26_s15, 0  ;;  %p37_p9 = scmp.eq.s32.totalorder %s1978_s21, 0 }
  0x14   : > { %p42_p10 = scmp.ne.s32.totalorder %s1970_s19, %s1966_s18  ;;  %p150_p13 = scmp.eq.s32.totalorder %s2049_s25, 1 }
  0x15   : > { %s2079_s17 = scalar_select %p27_p7, %s1974_s20, %s29_s16  }
  0x16   : > { %p2081_p11 = por %p37_p9, %p36_p8  ;;  %p2087_p12 = por %p43_p1, %p42_p10 }
  0x17   : > { %p156_p0 = scmp.eq.s32.totalorder %s1708_s13, 1  ;;  %p1765_p2 = scmp.lt.s32.totalorder %s1978_s21, 2 }
  0x18   : > { %s210_s24 = sand.u32 1, %s1974_s20   ;;  %p2094_p4 = por %p150_p13, %p36_p8 }
  0x19   : > { %p2098_p6 = por %p156_p0, %p42_p10  ;;  %s1713_s29 = sshll.u32 %s210_s24, 4 }
  0x1a   : > { %s1734_s30 = sshll.u32 %s1978_s21, 4  ;;  %s214_s9 = scalar_lea.vmem [#allocation3], %s1713_s29 }
  0x1b   : > { %s219_s8 = scalar_lea.hbm %s2755_s0, %s1734_s30  ;;  %s223_s10 = sshll.u32 %s214_s9, 4  ;;  %s224_s10 = int_to_ptr.vmem [resolvable:$true] %s223_s10 }
  0x1c   : > { %s221_s11 = sshll.u32 %s219_s8, 4  ;;  %p2108_p7 = pnand %p1765_p2, %p2081_p11  ;;  %s222_s11 = int_to_ptr.hbm [resolvable:$true] %s221_s11 }
  0x1d   : > { %s211_s13 = scalar_lea.sflag [#allocation4], %s210_s24  ;;  %s1878_s15 = sshra.s32 %s222_s11, 4  ;;  %s1879_s15 = int_to_ptr.hbm [resolvable:$true] %s1878_s15 }
  0x1e   : > { %s1880_s16 = scalar_lea.hbm %s1879_s15, 16  ;;  %p1882_p9 = pneg %p2108_p7 }
  0x1f   : > { %p1881_p8 = scmp.ne.s32.totalorder %s1879_s15, %s1880_s16  ;;  %s1885_s6 = scalar_lea.hbm %s2755_s0, 32 }
  0x20   : > { %p1886_p11 = scmp.lt.s32.totalorder %s1879_s15, %s2755_s0  ;;  %p1887_p0 = scmp.lt.s32.totalorder %s1885_s6, %s1880_s16 }
  0x21   : > { %p1883_p10 = pnand %p1882_p9, %p1881_p8 }
  0x22   : > { %p1888_p2 = por %p1887_p0, %p1886_p11 }
  0x23   : > { %p1884_p13 = pneg %p1883_p10 }
  0x25   : > { %p1889_p5 = pnand %p1888_p2, %p1884_p13 }
  0x27   : > { %1892 = shalt.err (!%p1889_p5)
}
  0x28   : > { %1758 = dma.hbm_to_vmem [thread:$0]  (!%p2108_p7), %s222_s11, 256, %s224_s10, %s211_s13  }
  0x29   : > { %232 = sbr.rel (%p2054_p3) target bundleno = 637 (0x27d), region = 40  ;;  %s2125_s24 = sand.u32 (!%p2054_p3), 1, %s1970_s19  }
  0x2a   : > { %s1717_s8 = sshll.u32 (!%p2054_p3), %s2125_s24, 4  ;;  %s235_s9 = scalar_lea.sflag (!%p2054_p3), [#allocation4], %s2125_s24 }
  0x2b   : > { %s2129_s29 = scalar_lea.vmem (!%p2054_p3), [#allocation3], %s1717_s8 }
  0x2e   : > { %1953 = dma.done.wait (%p2087_p12), %s235_s9, 256  }
  0x2f   : > { %1955 = vsyncadd (%p2087_p12), %s235_s9, 4294967040 }
  0x30   : > { %1957 = dma.done.wait (%p43_p1), [#allocation7], 33920  }
  0x31   : > { %1959 = vsyncadd (%p43_p1), [#allocation7], 4294933376  ;;  %v398_v0 = vld [vmem:[#allocation6 + $0x3c0] sm:$0xff]  ;;  %v399_v8 = vld [vmem:[#allocation6 + $0x3c8] sm:$0xff]  ;;  %s1986_s26 = smov 127   ;;  %s1987_s23 = smov 96  }
  0x32   : > { %v526_v1 = vld [vmem:[#allocation6 + $0x7c0] sm:$0xff]  ;;  %534 = vmatpush.msra.mxu0 %v398_v0  ;;  %v527_v9 = vld [vmem:[#allocation6 + $0x7c8] sm:$0xff]  ;;  %574 = vmatpush.msra.mxu2 %v399_v8  ;;  %v400_v62 = vld [vmem:[#allocation6 + $0x3d0] sm:$0xff]  ;;  %s1988_s10 = smov 95   ;;  %s1989_s11 = smov 32   ;;  %vm1422_vm8 = vcmask 588800  }
  0x33   : > { %v390_v2 = vld [vmem:[#allocation6 + $0x380] sm:$0xff]  ;;  %554 = vmatpush.msra.mxu1 %v526_v1  ;;  %v391_v10 = vld [vmem:[#allocation6 + $0x388] sm:$0xff]  ;;  %594 = vmatpush.msra.mxu3 %v527_v9  ;;  %v528_v63 = vld [vmem:[#allocation6 + $0x7d0] sm:$0xff]  ;;  %s1990_s12 = smov 1   ;;  %s1991_s13 = smov 97  }
  0x34   : > { %v518_v3 = vld [vmem:[#allocation6 + $0x780] sm:$0xff]  ;;  %535 = vmatpush.msra.mxu0 %v390_v2  ;;  %v519_v11 = vld [vmem:[#allocation6 + $0x788] sm:$0xff]  ;;  %575 = vmatpush.msra.mxu2 %v391_v10  ;;  %v392_v2 = vld [vmem:[#allocation6 + $0x390] sm:$0xff]  ;;  %s1992_s15 = smov 31   ;;  %s1993_s16 = smov 33  }
  0x35   : > { %v382_v4 = vld [vmem:[#allocation6 + $0x340] sm:$0xff]  ;;  %555 = vmatpush.msra.mxu1 %v518_v3  ;;  %v383_v14 = vld [vmem:[#allocation6 + $0x348] sm:$0xff]  ;;  %595 = vmatpush.msra.mxu3 %v519_v11  ;;  %v520_v3 = vld [vmem:[#allocation6 + $0x790] sm:$0xff]  ;;  %s1720_s8 = sshll.u32 %s2125_s24, 6  ;;  %s1928_s6 = scalar_lea.hbm %s2760_s5, 128 }
  0x36   : > { %v510_v5 = vld [vmem:[#allocation6 + $0x740] sm:$0xff]  ;;  %536 = vmatpush.msra.mxu0 %v382_v4  ;;  %v511_v15 = vld [vmem:[#allocation6 + $0x748] sm:$0xff]  ;;  %576 = vmatpush.msra.mxu2 %v383_v14  ;;  %v401_v8 = vld [vmem:[#allocation6 + $0x3d8] sm:$0xff]  ;;  %s275_s9 = scalar_lea.vmem [#allocation9], %s1720_s8 }
  0x37   : > { %v374_v6 = vld [vmem:[#allocation6 + $0x300] sm:$0xff]  ;;  %556 = vmatpush.msra.mxu1 %v510_v5  ;;  %v375_v18 = vld [vmem:[#allocation6 + $0x308] sm:$0xff]  ;;  %596 = vmatpush.msra.mxu3 %v511_v15  ;;  %v529_v9 = vld [vmem:[#allocation6 + $0x7d8] sm:$0xff] }
  0x38   : > { %v502_v7 = vld [vmem:[#allocation6 + $0x700] sm:$0xff]  ;;  %537 = vmatpush.msra.mxu0 %v374_v6  ;;  %v503_v19 = vld [vmem:[#allocation6 + $0x708] sm:$0xff]  ;;  %577 = vmatpush.msra.mxu2 %v375_v18  ;;  %v384_v6 = vld [vmem:[#allocation6 + $0x350] sm:$0xff] }
  0x39   : > { %v366_v12 = vld [vmem:[#allocation6 + $0x2c0] sm:$0xff]  ;;  %557 = vmatpush.msra.mxu1 %v502_v7  ;;  %v367_v22 = vld [vmem:[#allocation6 + $0x2c8] sm:$0xff]  ;;  %597 = vmatpush.msra.mxu3 %v503_v19  ;;  %v512_v7 = vld [vmem:[#allocation6 + $0x750] sm:$0xff] }
  0x3a   : > { %v494_v13 = vld [vmem:[#allocation6 + $0x6c0] sm:$0xff]  ;;  %538 = vmatpush.msra.mxu0 %v366_v12  ;;  %v495_v23 = vld [vmem:[#allocation6 + $0x6c8] sm:$0xff]  ;;  %578 = vmatpush.msra.mxu2 %v367_v22  ;;  %v376_v10 = vld [vmem:[#allocation6 + $0x310] sm:$0xff] }
  0x3b   : > { %v358_v16 = vld [vmem:[#allocation6 + $0x280] sm:$0xff]  ;;  %558 = vmatpush.msra.mxu1 %v494_v13  ;;  %v359_v26 = vld [vmem:[#allocation6 + $0x288] sm:$0xff]  ;;  %598 = vmatpush.msra.mxu3 %v495_v23  ;;  %v504_v11 = vld [vmem:[#allocation6 + $0x710] sm:$0xff] }
  0x3c   : > { %v486_v17 = vld [vmem:[#allocation6 + $0x680] sm:$0xff]  ;;  %539 = vmatpush.msra.mxu0 %v358_v16  ;;  %v487_v27 = vld [vmem:[#allocation6 + $0x688] sm:$0xff]  ;;  %579 = vmatpush.msra.mxu2 %v359_v26  ;;  %v393_v12 = vld [vmem:[#allocation6 + $0x398] sm:$0xff] }
  0x3d   : > { %v350_v20 = vld [vmem:[#allocation6 + $0x240] sm:$0xff]  ;;  %559 = vmatpush.msra.mxu1 %v486_v17  ;;  %v351_v30 = vld [vmem:[#allocation6 + $0x248] sm:$0xff]  ;;  %599 = vmatpush.msra.mxu3 %v487_v27  ;;  %v521_v13 = vld [vmem:[#allocation6 + $0x798] sm:$0xff] }
  0x3e   : > { %v478_v21 = vld [vmem:[#allocation6 + $0x640] sm:$0xff]  ;;  %540 = vmatpush.msra.mxu0 %v350_v20  ;;  %v479_v31 = vld [vmem:[#allocation6 + $0x648] sm:$0xff]  ;;  %580 = vmatpush.msra.mxu2 %v351_v30  ;;  %v368_v14 = vld [vmem:[#allocation6 + $0x2d0] sm:$0xff] }
  0x3f   : > { %v342_v24 = vld [vmem:[#allocation6 + $0x200] sm:$0xff]  ;;  %560 = vmatpush.msra.mxu1 %v478_v21  ;;  %v343_v34 = vld [vmem:[#allocation6 + $0x208] sm:$0xff]  ;;  %600 = vmatpush.msra.mxu3 %v479_v31  ;;  %v496_v15 = vld [vmem:[#allocation6 + $0x6d0] sm:$0xff] }
  0x40   : > { %v470_v25 = vld [vmem:[#allocation6 + $0x600] sm:$0xff]  ;;  %541 = vmatpush.msra.mxu0 %v342_v24  ;;  %v471_v35 = vld [vmem:[#allocation6 + $0x608] sm:$0xff]  ;;  %581 = vmatpush.msra.mxu2 %v343_v34  ;;  %v385_v16 = vld [vmem:[#allocation6 + $0x358] sm:$0xff] }
  0x41   : > { %v334_v28 = vld [vmem:[#allocation6 + $0x1c0] sm:$0xff]  ;;  %561 = vmatpush.msra.mxu1 %v470_v25  ;;  %v335_v38 = vld [vmem:[#allocation6 + $0x1c8] sm:$0xff]  ;;  %601 = vmatpush.msra.mxu3 %v471_v35  ;;  %v513_v17 = vld [vmem:[#allocation6 + $0x758] sm:$0xff] }
  0x42   : > { %v462_v29 = vld [vmem:[#allocation6 + $0x5c0] sm:$0xff]  ;;  %542 = vmatpush.msra.mxu0 %v334_v28  ;;  %v463_v39 = vld [vmem:[#allocation6 + $0x5c8] sm:$0xff]  ;;  %582 = vmatpush.msra.mxu2 %v335_v38  ;;  %v360_v18 = vld [vmem:[#allocation6 + $0x290] sm:$0xff] }
  0x43   : > { %v326_v32 = vld [vmem:[#allocation6 + $0x180] sm:$0xff]  ;;  %562 = vmatpush.msra.mxu1 %v462_v29  ;;  %v327_v42 = vld [vmem:[#allocation6 + $0x188] sm:$0xff]  ;;  %602 = vmatpush.msra.mxu3 %v463_v39  ;;  %v488_v19 = vld [vmem:[#allocation6 + $0x690] sm:$0xff] }
  0x44   : > { %v454_v33 = vld [vmem:[#allocation6 + $0x580] sm:$0xff]  ;;  %543 = vmatpush.msra.mxu0 %v326_v32  ;;  %v455_v43 = vld [vmem:[#allocation6 + $0x588] sm:$0xff]  ;;  %583 = vmatpush.msra.mxu2 %v327_v42  ;;  %v377_v20 = vld [vmem:[#allocation6 + $0x318] sm:$0xff] }
  0x45   : > { %v318_v36 = vld [vmem:[#allocation6 + $0x140] sm:$0xff]  ;;  %563 = vmatpush.msra.mxu1 %v454_v33  ;;  %v319_v46 = vld [vmem:[#allocation6 + $0x148] sm:$0xff]  ;;  %603 = vmatpush.msra.mxu3 %v455_v43  ;;  %v505_v21 = vld [vmem:[#allocation6 + $0x718] sm:$0xff] }
  0x46   : > { %v446_v37 = vld [vmem:[#allocation6 + $0x540] sm:$0xff]  ;;  %544 = vmatpush.msra.mxu0 %v318_v36  ;;  %v447_v47 = vld [vmem:[#allocation6 + $0x548] sm:$0xff]  ;;  %584 = vmatpush.msra.mxu2 %v319_v46  ;;  %v352_v22 = vld [vmem:[#allocation6 + $0x250] sm:$0xff] }
  0x47   : > { %v310_v40 = vld [vmem:[#allocation6 + $0x100] sm:$0xff]  ;;  %564 = vmatpush.msra.mxu1 %v446_v37  ;;  %v311_v50 = vld [vmem:[#allocation6 + $0x108] sm:$0xff]  ;;  %604 = vmatpush.msra.mxu3 %v447_v47  ;;  %v480_v23 = vld [vmem:[#allocation6 + $0x650] sm:$0xff] }
  0x48   : > { %v438_v41 = vld [vmem:[#allocation6 + $0x500] sm:$0xff]  ;;  %545 = vmatpush.msra.mxu0 %v310_v40  ;;  %v439_v51 = vld [vmem:[#allocation6 + $0x508] sm:$0xff]  ;;  %585 = vmatpush.msra.mxu2 %v311_v50  ;;  %v369_v24 = vld [vmem:[#allocation6 + $0x2d8] sm:$0xff] }
  0x49   : > { %v302_v44 = vld [vmem:[#allocation6 + $0xc0] sm:$0xff]  ;;  %565 = vmatpush.msra.mxu1 %v438_v41  ;;  %v303_v54 = vld [vmem:[#allocation6 + $0xc8] sm:$0xff]  ;;  %605 = vmatpush.msra.mxu3 %v439_v51  ;;  %v497_v25 = vld [vmem:[#allocation6 + $0x6d8] sm:$0xff] }
  0x4a   : > { %v430_v45 = vld [vmem:[#allocation6 + $0x4c0] sm:$0xff]  ;;  %546 = vmatpush.msra.mxu0 %v302_v44  ;;  %v431_v55 = vld [vmem:[#allocation6 + $0x4c8] sm:$0xff]  ;;  %586 = vmatpush.msra.mxu2 %v303_v54  ;;  %v344_v26 = vld [vmem:[#allocation6 + $0x210] sm:$0xff] }
  0x4b   : > { %v294_v48 = vld [vmem:[#allocation6 + $0x80] sm:$0xff]  ;;  %566 = vmatpush.msra.mxu1 %v430_v45  ;;  %v2143_v59 = vld [vmem:[%s2129_s29 + $0x8] sm:$0xff]  ;;  %606 = vmatpush.msra.mxu3 %v431_v55  ;;  %v472_v27 = vld [vmem:[#allocation6 + $0x610] sm:$0xff] }
  0x4c   : > { %v422_v49 = vld [vmem:[#allocation6 + $0x480] sm:$0xff]  ;;  %547 = vmatpush.msra.mxu0 %v294_v48  ;;  %v295_v60 = vld [vmem:[#allocation6 + $0x88] sm:$0xff]  ;;  %v361_v28 = vld [vmem:[#allocation6 + $0x298] sm:$0xff] }
  0x4d   : > { %v286_v52 = vld [vmem:[#allocation6 + $0x40] sm:$0xff]  ;;  %567 = vmatpush.msra.mxu1 %v422_v49  ;;  %v423_v61 = vld [vmem:[#allocation6 + $0x488] sm:$0xff]  ;;  %587 = vmatpush.msra.mxu2 %v295_v60  ;;  %v489_v29 = vld [vmem:[#allocation6 + $0x698] sm:$0xff] }
  0x4e   : > { %v414_v53 = vld [vmem:[#allocation6 + $0x440] sm:$0xff]  ;;  %548 = vmatpush.msra.mxu0 %v286_v52  ;;  %v287_v0 = vld [vmem:[#allocation6 + $0x48] sm:$0xff]  ;;  %607 = vmatpush.msra.mxu3 %v423_v61  ;;  %v336_v30 = vld [vmem:[#allocation6 + $0x1d0] sm:$0xff] }
  0x4f   : > { %v278_v56 = vld [vmem:[#allocation6] sm:$0xff]  ;;  %568 = vmatpush.msra.mxu1 %v414_v53  ;;  %v415_v1 = vld [vmem:[#allocation6 + $0x448] sm:$0xff]  ;;  %588 = vmatpush.msra.mxu2 %v287_v0  ;;  %v464_v31 = vld [vmem:[#allocation6 + $0x5d0] sm:$0xff] }
  0x50   : > { %v406_v57 = vld [vmem:[#allocation6 + $0x400] sm:$0xff]  ;;  %549 = vmatpush.msra.mxu0 %v278_v56  ;;  %v279_v4 = vld [vmem:[#allocation6 + $0x8] sm:$0xff]  ;;  %608 = vmatpush.msra.mxu3 %v415_v1  ;;  %v353_v32 = vld [vmem:[#allocation6 + $0x258] sm:$0xff] }
  0x51   : > { %v2140_v58 = vld [vmem:[%s2129_s29] sm:$0xff]  ;;  %569 = vmatpush.msra.mxu1 %v406_v57  ;;  %v407_v5 = vld [vmem:[#allocation6 + $0x408] sm:$0xff]  ;;  %589 = vmatpush.msra.mxu2 %v279_v4  ;;  %v481_v33 = vld [vmem:[#allocation6 + $0x658] sm:$0xff]  ;;  %s1735_s29 = sshll.u32 %s2049_s25, 6  ;;  %s1603_s25 = scalar_lea.sflag [#allocation5], %s2125_s24 }
  0x52   : > { %550 = vmatmul.f32.vlgmr.msra.gmra.mxu0 %v2140_v58  ;;  %570 = vmatmul.f32.vlgmr.msra.gmra.mxu1 %v2143_v59  ;;  %v328_v34 = vld [vmem:[#allocation6 + $0x190] sm:$0xff]  ;;  %v345_v36 = vld [vmem:[#allocation6 + $0x218] sm:$0xff] }
  0x53   : > { %614 = vmatpush.msrb.mxu0 %v400_v62  ;;  %634 = vmatpush.msrb.mxu1 %v528_v63  ;;  %v456_v35 = vld [vmem:[#allocation6 + $0x590] sm:$0xff]  ;;  %v473_v37 = vld [vmem:[#allocation6 + $0x618] sm:$0xff]  ;;  %v402_v62 = vld [vmem:[#allocation6 + $0x3e0] sm:$0xff] }
  0x54   : > { %609 = vmatpush.msra.mxu3 %v407_v5  ;;  %590 = vmatmul.f32.vlgmr.msra.gmra.mxu2 %v2140_v58  ;;  %v320_v38 = vld [vmem:[#allocation6 + $0x150] sm:$0xff]  ;;  %v337_v40 = vld [vmem:[#allocation6 + $0x1d8] sm:$0xff]  ;;  %v530_v63 = vld [vmem:[#allocation6 + $0x7e0] sm:$0xff] }
  0x55   : > { %615 = vmatpush.msrb.mxu0 %v392_v2  ;;  %635 = vmatpush.msrb.mxu1 %v520_v3  ;;  %v448_v39 = vld [vmem:[#allocation6 + $0x550] sm:$0xff]  ;;  %v465_v41 = vld [vmem:[#allocation6 + $0x5d8] sm:$0xff]  ;;  %v394_v2 = vld [vmem:[#allocation6 + $0x3a0] sm:$0xff] }
  0x56   : > { %610 = vmatmul.f32.vlgmr.msra.gmra.mxu3 %v2143_v59  ;;  %654 = vmatpush.msrb.mxu2 %v401_v8  ;;  %v312_v42 = vld [vmem:[#allocation6 + $0x110] sm:$0xff]  ;;  %v329_v44 = vld [vmem:[#allocation6 + $0x198] sm:$0xff]  ;;  %v522_v3 = vld [vmem:[#allocation6 + $0x7a0] sm:$0xff] }
  0x57   : > { %616 = vmatpush.msrb.mxu0 %v384_v6  ;;  %636 = vmatpush.msrb.mxu1 %v512_v7  ;;  %v440_v43 = vld [vmem:[#allocation6 + $0x510] sm:$0xff]  ;;  %v457_v45 = vld [vmem:[#allocation6 + $0x598] sm:$0xff]  ;;  %v386_v6 = vld [vmem:[#allocation6 + $0x360] sm:$0xff] }
  0x58   : > { %674 = vmatpush.msrb.mxu3 %v529_v9  ;;  %655 = vmatpush.msrb.mxu2 %v393_v12  ;;  %v304_v46 = vld [vmem:[#allocation6 + $0xd0] sm:$0xff]  ;;  %v321_v48 = vld [vmem:[#allocation6 + $0x158] sm:$0xff]  ;;  %v514_v7 = vld [vmem:[#allocation6 + $0x760] sm:$0xff] }
  0x59   : > { %617 = vmatpush.msrb.mxu0 %v376_v10  ;;  %637 = vmatpush.msrb.mxu1 %v504_v11  ;;  %v432_v47 = vld [vmem:[#allocation6 + $0x4d0] sm:$0xff]  ;;  %v449_v49 = vld [vmem:[#allocation6 + $0x558] sm:$0xff]  ;;  %v378_v10 = vld [vmem:[#allocation6 + $0x320] sm:$0xff] }
  0x5a   : > { %675 = vmatpush.msrb.mxu3 %v521_v13  ;;  %656 = vmatpush.msrb.mxu2 %v385_v16  ;;  %v296_v50 = vld [vmem:[#allocation6 + $0x90] sm:$0xff]  ;;  %v313_v52 = vld [vmem:[#allocation6 + $0x118] sm:$0xff]  ;;  %v506_v11 = vld [vmem:[#allocation6 + $0x720] sm:$0xff] }
  0x5b   : > { %618 = vmatpush.msrb.mxu0 %v368_v14  ;;  %638 = vmatpush.msrb.mxu1 %v496_v15  ;;  %v424_v51 = vld [vmem:[#allocation6 + $0x490] sm:$0xff]  ;;  %v441_v53 = vld [vmem:[#allocation6 + $0x518] sm:$0xff]  ;;  %v370_v12 = vld [vmem:[#allocation6 + $0x2e0] sm:$0xff] }
  0x5c   : > { %676 = vmatpush.msrb.mxu3 %v513_v17  ;;  %657 = vmatpush.msrb.mxu2 %v377_v20  ;;  %v288_v54 = vld [vmem:[#allocation6 + $0x50] sm:$0xff]  ;;  %v305_v56 = vld [vmem:[#allocation6 + $0xd8] sm:$0xff]  ;;  %v498_v13 = vld [vmem:[#allocation6 + $0x6e0] sm:$0xff] }
  0x5d   : > { %619 = vmatpush.msrb.mxu0 %v360_v18  ;;  %639 = vmatpush.msrb.mxu1 %v488_v19  ;;  %v416_v55 = vld [vmem:[#allocation6 + $0x450] sm:$0xff]  ;;  %v433_v57 = vld [vmem:[#allocation6 + $0x4d8] sm:$0xff]  ;;  %v403_v14 = vld [vmem:[#allocation6 + $0x3e8] sm:$0xff] }
  0x5e   : > { %677 = vmatpush.msrb.mxu3 %v505_v21  ;;  %658 = vmatpush.msrb.mxu2 %v369_v24  ;;  %v280_v60 = vld [vmem:[#allocation6 + $0x10] sm:$0xff]  ;;  %v297_v0 = vld [vmem:[#allocation6 + $0x98] sm:$0xff]  ;;  %v531_v15 = vld [vmem:[#allocation6 + $0x7e8] sm:$0xff] }
  0x5f   : > { %620 = vmatpush.msrb.mxu0 %v352_v22  ;;  %640 = vmatpush.msrb.mxu1 %v480_v23  ;;  %v408_v61 = vld [vmem:[#allocation6 + $0x410] sm:$0xff]  ;;  %v425_v1 = vld [vmem:[#allocation6 + $0x498] sm:$0xff]  ;;  %v362_v16 = vld [vmem:[#allocation6 + $0x2a0] sm:$0xff] }
  0x60   : > { %678 = vmatpush.msrb.mxu3 %v497_v25  ;;  %659 = vmatpush.msrb.mxu2 %v361_v28  ;;  %v289_v4 = vld [vmem:[#allocation6 + $0x58] sm:$0xff]  ;;  %v490_v17 = vld [vmem:[#allocation6 + $0x6a0] sm:$0xff]  ;;  %v395_v18 = vld [vmem:[#allocation6 + $0x3a8] sm:$0xff] }
  0x61   : > { %621 = vmatpush.msrb.mxu0 %v344_v26  ;;  %641 = vmatpush.msrb.mxu1 %v472_v27  ;;  %v417_v5 = vld [vmem:[#allocation6 + $0x458] sm:$0xff]  ;;  %v523_v19 = vld [vmem:[#allocation6 + $0x7a8] sm:$0xff]  ;;  %v354_v20 = vld [vmem:[#allocation6 + $0x260] sm:$0xff] }
  0x62   : > { %679 = vmatpush.msrb.mxu3 %v489_v29  ;;  %660 = vmatpush.msrb.mxu2 %v353_v32  ;;  %v281_v8 = vld [vmem:[#allocation6 + $0x18] sm:$0xff]  ;;  %v482_v21 = vld [vmem:[#allocation6 + $0x660] sm:$0xff]  ;;  %v387_v22 = vld [vmem:[#allocation6 + $0x368] sm:$0xff] }
  0x63   : > { %622 = vmatpush.msrb.mxu0 %v336_v30  ;;  %642 = vmatpush.msrb.mxu1 %v464_v31  ;;  %v409_v9 = vld [vmem:[#allocation6 + $0x418] sm:$0xff]  ;;  %v515_v23 = vld [vmem:[#allocation6 + $0x768] sm:$0xff]  ;;  %v346_v24 = vld [vmem:[#allocation6 + $0x220] sm:$0xff] }
  0x64   : > { %680 = vmatpush.msrb.mxu3 %v481_v33  ;;  %661 = vmatpush.msrb.mxu2 %v345_v36  ;;  %v474_v25 = vld [vmem:[#allocation6 + $0x620] sm:$0xff]  ;;  %v379_v26 = vld [vmem:[#allocation6 + $0x328] sm:$0xff] }
  0x65   : > { %623 = vmatpush.msrb.mxu0 %v328_v34  ;;  %643 = vmatpush.msrb.mxu1 %v456_v35  ;;  %v507_v27 = vld [vmem:[#allocation6 + $0x728] sm:$0xff]  ;;  %v338_v28 = vld [vmem:[#allocation6 + $0x1e0] sm:$0xff] }
  0x66   : > { %681 = vmatpush.msrb.mxu3 %v473_v37  ;;  %662 = vmatpush.msrb.mxu2 %v337_v40  ;;  %v466_v29 = vld [vmem:[#allocation6 + $0x5e0] sm:$0xff]  ;;  %v371_v30 = vld [vmem:[#allocation6 + $0x2e8] sm:$0xff] }
  0x67   : > { %624 = vmatpush.msrb.mxu0 %v320_v38  ;;  %644 = vmatpush.msrb.mxu1 %v448_v39  ;;  %v499_v31 = vld [vmem:[#allocation6 + $0x6e8] sm:$0xff]  ;;  %v330_v32 = vld [vmem:[#allocation6 + $0x1a0] sm:$0xff] }
  0x68   : > { %682 = vmatpush.msrb.mxu3 %v465_v41  ;;  %663 = vmatpush.msrb.mxu2 %v329_v44  ;;  %v458_v33 = vld [vmem:[#allocation6 + $0x5a0] sm:$0xff]  ;;  %v363_v34 = vld [vmem:[#allocation6 + $0x2a8] sm:$0xff] }
  0x69   : > { %625 = vmatpush.msrb.mxu0 %v312_v42  ;;  %645 = vmatpush.msrb.mxu1 %v440_v43  ;;  %v491_v35 = vld [vmem:[#allocation6 + $0x6a8] sm:$0xff]  ;;  %v322_v36 = vld [vmem:[#allocation6 + $0x160] sm:$0xff] }
  0x6a   : > { %683 = vmatpush.msrb.mxu3 %v457_v45  ;;  %664 = vmatpush.msrb.mxu2 %v321_v48  ;;  %v450_v37 = vld [vmem:[#allocation6 + $0x560] sm:$0xff]  ;;  %v355_v38 = vld [vmem:[#allocation6 + $0x268] sm:$0xff] }
  0x6b   : > { %626 = vmatpush.msrb.mxu0 %v304_v46  ;;  %646 = vmatpush.msrb.mxu1 %v432_v47  ;;  %v483_v39 = vld [vmem:[#allocation6 + $0x668] sm:$0xff]  ;;  %v314_v40 = vld [vmem:[#allocation6 + $0x120] sm:$0xff] }
  0x6c   : > { %684 = vmatpush.msrb.mxu3 %v449_v49  ;;  %665 = vmatpush.msrb.mxu2 %v313_v52  ;;  %v442_v41 = vld [vmem:[#allocation6 + $0x520] sm:$0xff]  ;;  %v347_v42 = vld [vmem:[#allocation6 + $0x228] sm:$0xff] }
  0x6d   : > { %627 = vmatpush.msrb.mxu0 %v296_v50  ;;  %647 = vmatpush.msrb.mxu1 %v424_v51  ;;  %v475_v43 = vld [vmem:[#allocation6 + $0x628] sm:$0xff]  ;;  %v306_v44 = vld [vmem:[#allocation6 + $0xe0] sm:$0xff] }
  0x6e   : > { %685 = vmatpush.msrb.mxu3 %v441_v53  ;;  %666 = vmatpush.msrb.mxu2 %v305_v56  ;;  %v434_v45 = vld [vmem:[#allocation6 + $0x4e0] sm:$0xff]  ;;  %v339_v46 = vld [vmem:[#allocation6 + $0x1e8] sm:$0xff] }
  0x6f   : > { %628 = vmatpush.msrb.mxu0 %v288_v54  ;;  %648 = vmatpush.msrb.mxu1 %v416_v55  ;;  %v467_v47 = vld [vmem:[#allocation6 + $0x5e8] sm:$0xff]  ;;  %v298_v48 = vld [vmem:[#allocation6 + $0xa0] sm:$0xff] }
  0x70   : > { %686 = vmatpush.msrb.mxu3 %v433_v57  ;;  %667 = vmatpush.msrb.mxu2 %v297_v0  ;;  %v426_v49 = vld [vmem:[#allocation6 + $0x4a0] sm:$0xff]  ;;  %v331_v50 = vld [vmem:[#allocation6 + $0x1a8] sm:$0xff] }
  0x71   : > { %629 = vmatpush.msrb.mxu0 %v280_v60  ;;  %649 = vmatpush.msrb.mxu1 %v408_v61  ;;  %v459_v51 = vld [vmem:[#allocation6 + $0x5a8] sm:$0xff]  ;;  %v290_v52 = vld [vmem:[#allocation6 + $0x60] sm:$0xff] }
  0x72   : > { %630 = vmatmul.f32.vlgmr.msrb.gmra.mxu0 %v2140_v58  ;;  %650 = vmatmul.f32.vlgmr.msrb.gmra.mxu1 %v2143_v59  ;;  %v418_v53 = vld [vmem:[#allocation6 + $0x460] sm:$0xff]  ;;  %v323_v54 = vld [vmem:[#allocation6 + $0x168] sm:$0xff] }
  0x73   : > { %694 = vmatpush.msra.mxu0 %v402_v62  ;;  %714 = vmatpush.msra.mxu1 %v530_v63  ;;  %v451_v55 = vld [vmem:[#allocation6 + $0x568] sm:$0xff]  ;;  %v282_v56 = vld [vmem:[#allocation6 + $0x20] sm:$0xff]  ;;  %v404_v62 = vld [vmem:[#allocation6 + $0x3f0] sm:$0xff] }
  0x74   : > { %687 = vmatpush.msrb.mxu3 %v425_v1  ;;  %668 = vmatpush.msrb.mxu2 %v289_v4  ;;  %v410_v57 = vld [vmem:[#allocation6 + $0x420] sm:$0xff]  ;;  %v315_v60 = vld [vmem:[#allocation6 + $0x128] sm:$0xff]  ;;  %v532_v63 = vld [vmem:[#allocation6 + $0x7f0] sm:$0xff] }
  0x75   : > { %695 = vmatpush.msra.mxu0 %v394_v2  ;;  %715 = vmatpush.msra.mxu1 %v522_v3  ;;  %v443_v61 = vld [vmem:[#allocation6 + $0x528] sm:$0xff]  ;;  %v396_v2 = vld [vmem:[#allocation6 + $0x3b0] sm:$0xff] }
  0x76   : > { %688 = vmatpush.msrb.mxu3 %v417_v5  ;;  %669 = vmatpush.msrb.mxu2 %v281_v8  ;;  %v307_v0 = vld [vmem:[#allocation6 + $0xe8] sm:$0xff]  ;;  %v524_v3 = vld [vmem:[#allocation6 + $0x7b0] sm:$0xff] }
  0x77   : > { %696 = vmatpush.msra.mxu0 %v386_v6  ;;  %716 = vmatpush.msra.mxu1 %v514_v7  ;;  %v435_v1 = vld [vmem:[#allocation6 + $0x4e8] sm:$0xff]  ;;  %v388_v6 = vld [vmem:[#allocation6 + $0x370] sm:$0xff] }
  0x78   : > { %689 = vmatpush.msrb.mxu3 %v409_v9  ;;  %670 = vmatmul.f32.vlgmr.msrb.gmra.mxu2 %v2140_v58  ;;  %v299_v4 = vld [vmem:[#allocation6 + $0xa8] sm:$0xff]  ;;  %v516_v7 = vld [vmem:[#allocation6 + $0x770] sm:$0xff] }
  0x79   : > { %697 = vmatpush.msra.mxu0 %v378_v10  ;;  %717 = vmatpush.msra.mxu1 %v506_v11  ;;  %v427_v5 = vld [vmem:[#allocation6 + $0x4a8] sm:$0xff]  ;;  %v380_v10 = vld [vmem:[#allocation6 + $0x330] sm:$0xff] }
  0x7a   : > { %690 = vmatmul.f32.vlgmr.msrb.gmra.mxu3 %v2143_v59  ;;  %734 = vmatpush.msra.mxu2 %v403_v14  ;;  %v291_v8 = vld [vmem:[#allocation6 + $0x68] sm:$0xff]  ;;  %v508_v11 = vld [vmem:[#allocation6 + $0x730] sm:$0xff] }
  0x7b   : > { %698 = vmatpush.msra.mxu0 %v370_v12  ;;  %718 = vmatpush.msra.mxu1 %v498_v13  ;;  %v419_v9 = vld [vmem:[#allocation6 + $0x468] sm:$0xff]  ;;  %v372_v14 = vld [vmem:[#allocation6 + $0x2f0] sm:$0xff] }
  0x7c   : > { %754 = vmatpush.msra.mxu3 %v531_v15  ;;  %735 = vmatpush.msra.mxu2 %v395_v18  ;;  %v283_v12 = vld [vmem:[#allocation6 + $0x28] sm:$0xff]  ;;  %v500_v15 = vld [vmem:[#allocation6 + $0x6f0] sm:$0xff]  ;;  %v405_v18 = vld [vmem:[#allocation6 + $0x3f8] sm:$0xff] }
  0x7d   : > { %699 = vmatpush.msra.mxu0 %v362_v16  ;;  %719 = vmatpush.msra.mxu1 %v490_v17  ;;  %v411_v13 = vld [vmem:[#allocation6 + $0x428] sm:$0xff]  ;;  %v364_v16 = vld [vmem:[#allocation6 + $0x2b0] sm:$0xff] }
  0x7e   : > { %755 = vmatpush.msra.mxu3 %v523_v19  ;;  %736 = vmatpush.msra.mxu2 %v387_v22  ;;  %v492_v17 = vld [vmem:[#allocation6 + $0x6b0] sm:$0xff]  ;;  %v533_v19 = vld [vmem:[#allocation6 + $0x7f8] sm:$0xff] }
  0x7f   : > { %700 = vmatpush.msra.mxu0 %v354_v20  ;;  %720 = vmatpush.msra.mxu1 %v482_v21  ;;  %v356_v20 = vld [vmem:[#allocation6 + $0x270] sm:$0xff]  ;;  %v397_v22 = vld [vmem:[#allocation6 + $0x3b8] sm:$0xff] }
  0x80   : > { %756 = vmatpush.msra.mxu3 %v515_v23  ;;  %737 = vmatpush.msra.mxu2 %v379_v26  ;;  %v484_v21 = vld [vmem:[#allocation6 + $0x670] sm:$0xff]  ;;  %v525_v23 = vld [vmem:[#allocation6 + $0x7b8] sm:$0xff] }
  0x81   : > { %701 = vmatpush.msra.mxu0 %v346_v24  ;;  %721 = vmatpush.msra.mxu1 %v474_v25  ;;  %v348_v24 = vld [vmem:[#allocation6 + $0x230] sm:$0xff]  ;;  %v389_v26 = vld [vmem:[#allocation6 + $0x378] sm:$0xff] }
  0x82   : > { %757 = vmatpush.msra.mxu3 %v507_v27  ;;  %738 = vmatpush.msra.mxu2 %v371_v30  ;;  %v476_v25 = vld [vmem:[#allocation6 + $0x630] sm:$0xff]  ;;  %v517_v27 = vld [vmem:[#allocation6 + $0x778] sm:$0xff] }
  0x83   : > { %702 = vmatpush.msra.mxu0 %v338_v28  ;;  %722 = vmatpush.msra.mxu1 %v466_v29  ;;  %v340_v28 = vld [vmem:[#allocation6 + $0x1f0] sm:$0xff]  ;;  %v381_v30 = vld [vmem:[#allocation6 + $0x338] sm:$0xff] }
  0x84   : > { %758 = vmatpush.msra.mxu3 %v499_v31  ;;  %739 = vmatpush.msra.mxu2 %v363_v34  ;;  %v468_v29 = vld [vmem:[#allocation6 + $0x5f0] sm:$0xff]  ;;  %v509_v31 = vld [vmem:[#allocation6 + $0x738] sm:$0xff] }
  0x85   : > { %703 = vmatpush.msra.mxu0 %v330_v32  ;;  %723 = vmatpush.msra.mxu1 %v458_v33  ;;  %v332_v32 = vld [vmem:[#allocation6 + $0x1b0] sm:$0xff]  ;;  %v373_v34 = vld [vmem:[#allocation6 + $0x2f8] sm:$0xff] }
  0x86   : > { %759 = vmatpush.msra.mxu3 %v491_v35  ;;  %740 = vmatpush.msra.mxu2 %v355_v38  ;;  %v460_v33 = vld [vmem:[#allocation6 + $0x5b0] sm:$0xff]  ;;  %v501_v35 = vld [vmem:[#allocation6 + $0x6f8] sm:$0xff] }
  0x87   : > { %704 = vmatpush.msra.mxu0 %v322_v36  ;;  %724 = vmatpush.msra.mxu1 %v450_v37  ;;  %v324_v36 = vld [vmem:[#allocation6 + $0x170] sm:$0xff]  ;;  %v365_v38 = vld [vmem:[#allocation6 + $0x2b8] sm:$0xff] }
  0x88   : > { %760 = vmatpush.msra.mxu3 %v483_v39  ;;  %741 = vmatpush.msra.mxu2 %v347_v42  ;;  %v452_v37 = vld [vmem:[#allocation6 + $0x570] sm:$0xff]  ;;  %v493_v39 = vld [vmem:[#allocation6 + $0x6b8] sm:$0xff] }
  0x89   : > { %705 = vmatpush.msra.mxu0 %v314_v40  ;;  %725 = vmatpush.msra.mxu1 %v442_v41  ;;  %v316_v40 = vld [vmem:[#allocation6 + $0x130] sm:$0xff]  ;;  %v357_v42 = vld [vmem:[#allocation6 + $0x278] sm:$0xff] }
  0x8a   : > { %761 = vmatpush.msra.mxu3 %v475_v43  ;;  %742 = vmatpush.msra.mxu2 %v339_v46  ;;  %v444_v41 = vld [vmem:[#allocation6 + $0x530] sm:$0xff]  ;;  %v485_v43 = vld [vmem:[#allocation6 + $0x678] sm:$0xff] }
  0x8b   : > { %706 = vmatpush.msra.mxu0 %v306_v44  ;;  %726 = vmatpush.msra.mxu1 %v434_v45  ;;  %v308_v44 = vld [vmem:[#allocation6 + $0xf0] sm:$0xff]  ;;  %v349_v46 = vld [vmem:[#allocation6 + $0x238] sm:$0xff] }
  0x8c   : > { %762 = vmatpush.msra.mxu3 %v467_v47  ;;  %743 = vmatpush.msra.mxu2 %v331_v50  ;;  %v436_v45 = vld [vmem:[#allocation6 + $0x4f0] sm:$0xff]  ;;  %v477_v47 = vld [vmem:[#allocation6 + $0x638] sm:$0xff] }
  0x8d   : > { %707 = vmatpush.msra.mxu0 %v298_v48  ;;  %727 = vmatpush.msra.mxu1 %v426_v49  ;;  %v300_v48 = vld [vmem:[#allocation6 + $0xb0] sm:$0xff]  ;;  %v341_v50 = vld [vmem:[#allocation6 + $0x1f8] sm:$0xff] }
  0x8e   : > { %763 = vmatpush.msra.mxu3 %v459_v51  ;;  %744 = vmatpush.msra.mxu2 %v323_v54  ;;  %v428_v49 = vld [vmem:[#allocation6 + $0x4b0] sm:$0xff]  ;;  %v469_v51 = vld [vmem:[#allocation6 + $0x5f8] sm:$0xff] }
  0x8f   : > { %708 = vmatpush.msra.mxu0 %v290_v52  ;;  %728 = vmatpush.msra.mxu1 %v418_v53  ;;  %v292_v52 = vld [vmem:[#allocation6 + $0x70] sm:$0xff]  ;;  %v333_v54 = vld [vmem:[#allocation6 + $0x1b8] sm:$0xff] }
  0x90   : > { %764 = vmatpush.msra.mxu3 %v451_v55  ;;  %745 = vmatpush.msra.mxu2 %v315_v60  ;;  %v420_v53 = vld [vmem:[#allocation6 + $0x470] sm:$0xff]  ;;  %v461_v55 = vld [vmem:[#allocation6 + $0x5b8] sm:$0xff] }
  0x91   : > { %709 = vmatpush.msra.mxu0 %v282_v56  ;;  %729 = vmatpush.msra.mxu1 %v410_v57  ;;  %v284_v56 = vld [vmem:[#allocation6 + $0x30] sm:$0xff]  ;;  %v325_v60 = vld [vmem:[#allocation6 + $0x178] sm:$0xff] }
  0x92   : > { %710 = vmatmul.f32.vlgmr.msra.gmra.mxu0 %v2140_v58  ;;  %730 = vmatmul.f32.vlgmr.msra.gmra.mxu1 %v2143_v59  ;;  %v412_v57 = vld [vmem:[#allocation6 + $0x430] sm:$0xff] }
  0x93   : > { %765 = vmatpush.msra.mxu3 %v443_v61  ;;  %774 = vmatpush.msrb.mxu0 %v404_v62  ;;  %v453_v61 = vld [vmem:[#allocation6 + $0x578] sm:$0xff] }
  0x94   : > { %794 = vmatpush.msrb.mxu1 %v532_v63  ;;  %746 = vmatpush.msra.mxu2 %v307_v0  ;;  %v317_v62 = vld [vmem:[#allocation6 + $0x138] sm:$0xff] }
  0x95   : > { %766 = vmatpush.msra.mxu3 %v435_v1  ;;  %775 = vmatpush.msrb.mxu0 %v396_v2  ;;  %v445_v63 = vld [vmem:[#allocation6 + $0x538] sm:$0xff] }
  0x96   : > { %795 = vmatpush.msrb.mxu1 %v524_v3  ;;  %747 = vmatpush.msra.mxu2 %v299_v4  ;;  %v309_v0 = vld [vmem:[#allocation6 + $0xf8] sm:$0xff] }
  0x97   : > { %767 = vmatpush.msra.mxu3 %v427_v5  ;;  %776 = vmatpush.msrb.mxu0 %v388_v6  ;;  %v437_v1 = vld [vmem:[#allocation6 + $0x4f8] sm:$0xff] }
  0x98   : > { %796 = vmatpush.msrb.mxu1 %v516_v7  ;;  %748 = vmatpush.msra.mxu2 %v291_v8  ;;  %v301_v2 = vld [vmem:[#allocation6 + $0xb8] sm:$0xff] }
  0x99   : > { %768 = vmatpush.msra.mxu3 %v419_v9  ;;  %777 = vmatpush.msrb.mxu0 %v380_v10  ;;  %v429_v3 = vld [vmem:[#allocation6 + $0x4b8] sm:$0xff] }
  0x9a   : > { %797 = vmatpush.msrb.mxu1 %v508_v11  ;;  %749 = vmatpush.msra.mxu2 %v283_v12  ;;  %v293_v4 = vld [vmem:[#allocation6 + $0x78] sm:$0xff] }
  0x9b   : > { %769 = vmatpush.msra.mxu3 %v411_v13  ;;  %778 = vmatpush.msrb.mxu0 %v372_v14  ;;  %v421_v5 = vld [vmem:[#allocation6 + $0x478] sm:$0xff] }
  0x9c   : > { %798 = vmatpush.msrb.mxu1 %v500_v15  ;;  %750 = vmatmul.f32.vlgmr.msra.gmra.mxu2 %v2140_v58  ;;  %v285_v6 = vld [vmem:[#allocation6 + $0x38] sm:$0xff] }
  0x9d   : > { %770 = vmatmul.f32.vlgmr.msra.gmra.mxu3 %v2143_v59  ;;  %779 = vmatpush.msrb.mxu0 %v364_v16  ;;  %v413_v7 = vld [vmem:[#allocation6 + $0x438] sm:$0xff] }
  0x9e   : > { %799 = vmatpush.msrb.mxu1 %v492_v17  ;;  %814 = vmatpush.msrb.mxu2 %v405_v18 }
  0x9f   : > { %834 = vmatpush.msrb.mxu3 %v533_v19  ;;  %780 = vmatpush.msrb.mxu0 %v356_v20 }
  0xa0   : > { %800 = vmatpush.msrb.mxu1 %v484_v21  ;;  %815 = vmatpush.msrb.mxu2 %v397_v22 }
  0xa1   : > { %835 = vmatpush.msrb.mxu3 %v525_v23  ;;  %781 = vmatpush.msrb.mxu0 %v348_v24 }
  0xa2   : > { %801 = vmatpush.msrb.mxu1 %v476_v25  ;;  %816 = vmatpush.msrb.mxu2 %v389_v26 }
  0xa3   : > { %836 = vmatpush.msrb.mxu3 %v517_v27  ;;  %782 = vmatpush.msrb.mxu0 %v340_v28 }
  0xa4   : > { %802 = vmatpush.msrb.mxu1 %v468_v29  ;;  %817 = vmatpush.msrb.mxu2 %v381_v30 }
  0xa5   : > { %837 = vmatpush.msrb.mxu3 %v509_v31  ;;  %783 = vmatpush.msrb.mxu0 %v332_v32 }
  0xa6   : > { %803 = vmatpush.msrb.mxu1 %v460_v33  ;;  %818 = vmatpush.msrb.mxu2 %v373_v34 }
  0xa7   : > { %838 = vmatpush.msrb.mxu3 %v501_v35  ;;  %784 = vmatpush.msrb.mxu0 %v324_v36  ;;  %v870_v35 = vlaneseq }
  0xa8   : > { %804 = vmatpush.msrb.mxu1 %v452_v37  ;;  %819 = vmatpush.msrb.mxu2 %v365_v38 }
  0xa9   : > { %839 = vmatpush.msrb.mxu3 %v493_v39  ;;  %785 = vmatpush.msrb.mxu0 %v316_v40  ;;  %v2291_v40 = vld [vmem:[#allocation8 + $0x40] sm:$0xff] }
  0xaa   : > { %805 = vmatpush.msrb.mxu1 %v444_v41  ;;  %820 = vmatpush.msrb.mxu2 %v357_v42  ;;  %v2293_v41 = vand.u32 127, %v870_v35  ;;  %v1311_v42 = vperm.slane %v2291_v40, 0 }
  0xab   : > { %840 = vmatpush.msrb.mxu3 %v485_v43  ;;  %786 = vmatpush.msrb.mxu0 %v308_v44 }
  0xac   : > { %806 = vmatpush.msrb.mxu1 %v436_v45  ;;  %821 = vmatpush.msrb.mxu2 %v349_v46  ;;  %vm1299_vm0 = vcmp.lt.s32.totalorder %v2293_v41, 95  ;;  %vm1179_vm1 = vcmp.lt.s32.totalorder %v2293_v41, 97  ;;  %vm1239_vm2 = vcmp.lt.s32.totalorder %v2293_v41, 96  ;;  %vm1119_vm3 = vcmp.lt.s32.totalorder %v2293_v41, 127 }
  0xad   : > { %841 = vmatpush.msrb.mxu3 %v477_v47  ;;  %787 = vmatpush.msrb.mxu0 %v300_v48  ;;  %v2310_v48 = vld [vmem:[#allocation8 + $0x38] sm:$0xff]  ;;  %vm1051_vm4 = vcmp.lt.s32.totalorder %v2293_v41, 1  ;;  %vm991_vm5 = vcmp.lt.s32.totalorder %v2293_v41, 31  ;;  %vm931_vm6 = vcmp.lt.s32.totalorder %v2293_v41, 32  ;;  %vm872_vm7 = vcmp.lt.s32.totalorder %v2293_v41, 33 }
  0xae   : > { %807 = vmatpush.msrb.mxu1 %v428_v49  ;;  %822 = vmatpush.msrb.mxu2 %v341_v50  ;;  %v2316_v49 = vld [vmem:[#allocation8 + $0x30] sm:$0xff]  ;;  %v1251_v50 = vperm.slane %v2310_v48, 0 }
  0xaf   : > { %842 = vmatpush.msrb.mxu3 %v469_v51  ;;  %788 = vmatpush.msrb.mxu0 %v292_v52  ;;  %v2323_v51 = vld [vmem:[#allocation8 + $0x28] sm:$0xff] }
  0xb0   : > { %808 = vmatpush.msrb.mxu1 %v420_v53  ;;  %823 = vmatpush.msrb.mxu2 %v333_v54  ;;  %v1191_v54 = vperm.slane %v2316_v49, 0 }
  0xb1   : > { %843 = vmatpush.msrb.mxu3 %v461_v55  ;;  %789 = vmatpush.msrb.mxu0 %v284_v56 }
  0xb2   : > { %809 = vmatpush.msrb.mxu1 %v412_v57  ;;  %824 = vmatpush.msrb.mxu2 %v325_v60  ;;  %v1131_v60 = vperm.slane %v2323_v51, 0 }
  0xb3   : > { %844 = vmatpush.msrb.mxu3 %v453_v61  ;;  %790 = vmatmul.f32.vlgmr.msrb.gmra.mxu0 %v2140_v58 }
  0xb4   : > { %810 = vmatmul.f32.vlgmr.msrb.gmra.mxu1 %v2143_v59  ;;  %825 = vmatpush.msrb.mxu2 %v317_v62 }
  0xb5   : > { %845 = vmatpush.msrb.mxu3 %v445_v63 }
  0xb6   : > { %826 = vmatpush.msrb.mxu2 %v309_v0 }
  0xb7   : > { %846 = vmatpush.msrb.mxu3 %v437_v1 }
  0xb8   : > { %827 = vmatpush.msrb.mxu2 %v301_v2 }
  0xb9   : > { %847 = vmatpush.msrb.mxu3 %v429_v3 }
  0xba   : > { %828 = vmatpush.msrb.mxu2 %v293_v4  ;;  %v1312_v4 = vperm.slane %v2291_v40, 1 }
  0xbb   : > { %848 = vmatpush.msrb.mxu3 %v421_v5 }
  0xbc   : > { %829 = vmatpush.msrb.mxu2 %v285_v6 }
  0xbd   : > { %849 = vmatpush.msrb.mxu3 %v413_v7  ;;  %830 = vmatmul.f32.vlgmr.msrb.gmra.mxu2 %v2140_v58  ;;  %v1252_v7 = vperm.slane %v2310_v48, 1 }
  0xbe   : > { %850 = vmatmul.f32.vlgmr.msrb.gmra.mxu3 %v2143_v59 }
  0xcf   : > { %v551_v8 = vpop.f32.mrf.mxu0  ;;  %v571_v9 = vpop.f32.mrf.mxu1 }
  0xd0   : > { %v2161_v10 = vadd.f32 %v571_v9, %v551_v8 }
  0xd2   : > { %1103 = vrot.lane.b32.xlu1 %v2161_v10, %s1986_s26  ;;  %1223 = vrot.lane.b32.xlu2 %v2161_v10, %s1987_s23 }
  0xd3   : > { %1283 = vrot.lane.b32.xlu0 %v2161_v10, %s1988_s10 }
  0xd7   : > { %v591_v58 = vpop.f32.mrf.mxu2 }
  0xd9   : > { %v611_v59 = vpop.f32.mrf.mxu3 }
  0xda   : > { %915 = vrot.lane.b32.xlu1 %v2161_v10, %s1989_s11  ;;  %1035 = vrot.lane.b32.xlu2 %v2161_v10, %s1990_s12  ;;  %v2175_v11 = vadd.f32 %v611_v59, %v591_v58 }
  0xdb   : > { %1163 = vrot.lane.b32.xlu0 %v2161_v10, %s1991_s13 }
  0xe2   : > { %1285 = vrot.lane.b32.xlu1 %v2175_v11, %s1988_s10  ;;  %975 = vrot.lane.b32.xlu2 %v2161_v10, %s1992_s15 }
  0xe3   : > { %854 = vrot.lane.b32.xlu0 %v2161_v10, %s1993_s16 }
  0xea   : > { %1165 = vrot.lane.b32.xlu1 %v2175_v11, %s1991_s13  ;;  %1105 = vrot.lane.b32.xlu2 %v2175_v11, %s1986_s26 }
  0xeb   : > { %1225 = vrot.lane.b32.xlu0 %v2175_v11, %s1987_s23 }
  0xef   : > { %v631_v12 = vpop.f32.mrf.mxu0  ;;  %v651_v13 = vpop.f32.mrf.mxu1 }
  0xf0   : > { %v2195_v14 = vadd.f32 %v651_v13, %v631_v12  ;;  %v1192_v12 = vperm.slane %v2316_v49, 1 }
  0xf2   : > { %977 = vrot.lane.b32.xlu1 %v2175_v11, %s1992_s15  ;;  %917 = vrot.lane.b32.xlu2 %v2175_v11, %s1989_s11 }
  0xf3   : > { %1037 = vrot.lane.b32.xlu0 %v2175_v11, %s1990_s12 }
  0xfa   : > { %1227 = vrot.lane.b32.xlu1 %v2195_v14, %s1987_s23  ;;  %856 = vrot.lane.b32.xlu2 %v2175_v11, %s1993_s16 }
  0xfb   : > { %1287 = vrot.lane.b32.xlu0 %v2195_v14, %s1988_s10  ;;  %v671_v15 = vpop.f32.mrf.mxu2 }
  0xfd   : > { %v691_v16 = vpop.f32.mrf.mxu3 }
  0xfe   : > { %v2209_v17 = vadd.f32 %v691_v16, %v671_v15 }
 0x102   : > { %1039 = vrot.lane.b32.xlu1 %v2195_v14, %s1990_s12  ;;  %979 = vrot.lane.b32.xlu2 %v2195_v14, %s1992_s15 }
 0x103   : > { %1167 = vrot.lane.b32.xlu0 %v2195_v14, %s1991_s13 }
 0x10a   : > { %1169 = vrot.lane.b32.xlu1 %v2209_v17, %s1991_s13  ;;  %1229 = vrot.lane.b32.xlu2 %v2209_v17, %s1987_s23 }
 0x10b   : > { %1107 = vrot.lane.b32.xlu0 %v2195_v14, %s1986_s26 }
 0x10f   : > { %v711_v18 = vpop.f32.mrf.mxu0  ;;  %v731_v19 = vpop.f32.mrf.mxu1 }
 0x110   : > { %v2223_v20 = vadd.f32 %v731_v19, %v711_v18 }
 0x112   : > { %1109 = vrot.lane.b32.xlu1 %v2209_v17, %s1986_s26  ;;  %1041 = vrot.lane.b32.xlu2 %v2209_v17, %s1990_s12 }
 0x113   : > { %919 = vrot.lane.b32.xlu0 %v2195_v14, %s1989_s11 }
 0x11a   : > { %921 = vrot.lane.b32.xlu1 %v2209_v17, %s1989_s11  ;;  %1231 = vrot.lane.b32.xlu2 %v2223_v20, %s1987_s23 }
 0x11b   : > { %858 = vrot.lane.b32.xlu0 %v2195_v14, %s1993_s16 }
 0x11f   : > { %v751_v21 = vpop.f32.mrf.mxu2 }
 0x120   : > { %v771_v22 = vpop.f32.mrf.mxu3 }
 0x121   : > { %v2245_v24 = vadd.f32 %v771_v22, %v751_v21  ;;  %v1132_v21 = vperm.slane %v2323_v51, 1  ;;  %v2389_v22 = vld [vmem:[#allocation8 + $0x18] sm:$0xff] }
 0x122   : > { %860 = vrot.lane.b32.xlu1 %v2209_v17, %s1993_s16  ;;  %1171 = vrot.lane.b32.xlu2 %v2223_v20, %s1991_s13 }
 0x123   : > { %1289 = vrot.lane.b32.xlu0 %v2209_v17, %s1988_s10 }
 0x12a   : > { %1291 = vrot.lane.b32.xlu1 %v2223_v20, %s1988_s10  ;;  %1111 = vrot.lane.b32.xlu2 %v2223_v20, %s1986_s26 }
 0x12b   : > { %981 = vrot.lane.b32.xlu0 %v2209_v17, %s1992_s15 }
 0x12c   : > { %v2243_v23 = vpop.permute.xlu2 %1223 }
 0x130   : > { %v791_v26 = vpop.f32.mrf.mxu0 }
 0x131   : > { %v811_v27 = vpop.f32.mrf.mxu1 }
 0x132   : > { %1293 = vrot.lane.b32.xlu1 %v2245_v24, %s1988_s10  ;;  %1113 = vrot.lane.b32.xlu2 %v2245_v24, %s1986_s26  ;;  %v2263_v29 = vadd.f32 %v811_v27, %v791_v26 }
 0x133   : > { %1173 = vrot.lane.b32.xlu0 %v2245_v24, %s1991_s13 }
 0x134   : > { %v2253_v25 = vpop.permute.xlu2 %1035 }
 0x13a   : > { %1233 = vrot.lane.b32.xlu1 %v2245_v24, %s1987_s23  ;;  %925 = vrot.lane.b32.xlu2 %v2245_v24, %s1989_s11 }
 0x13b   : > { %985 = vrot.lane.b32.xlu0 %v2245_v24, %s1992_s15 }
 0x13c   : > { %v2261_v28 = vpop.permute.xlu2 %975 }
 0x140   : > { %v831_v33 = vpop.f32.mrf.mxu2 }
 0x141   : > { %v851_v34 = vpop.f32.mrf.mxu3 }
 0x142   : > { %1045 = vrot.lane.b32.xlu1 %v2245_v24, %s1990_s12  ;;  %1235 = vrot.lane.b32.xlu2 %v2263_v29, %s1987_s23  ;;  %v2289_v39 = vadd.f32 %v851_v34, %v831_v33  ;;  %v2396_v34 = vld [vmem:[#allocation8 + $0x10] sm:$0xff] }
 0x143   : > { %1175 = vrot.lane.b32.xlu0 %v2263_v29, %s1991_s13 }
 0x144   : > { %v2271_v30 = vpop.permute.xlu1 %1103  ;;  %v2273_v31 = vpop.permute.xlu2 %1105 }
 0x145   : > { %v2275_v32 = vpop.permute.xlu0 %1283  ;;  %v1126_v62 = vsel %vm1119_vm3, %v2271_v30, %v2273_v31 }
 0x146   : > { %v1147_v0 = vmul.f32 %v1131_v60, %v1126_v62 }
 0x14a   : > { %864 = vrot.lane.b32.xlu1 %v2245_v24, %s1993_s16  ;;  %1115 = vrot.lane.b32.xlu2 %v2263_v29, %s1986_s26 }
 0x14b   : > { %927 = vrot.lane.b32.xlu0 %v2263_v29, %s1989_s11 }
 0x14c   : > { %v2283_v36 = vpop.permute.xlu1 %915  ;;  %v2285_v37 = vpop.permute.xlu2 %917 }
 0x14d   : > { %v2287_v38 = vpop.permute.xlu0 %1163 }
 0x152   : > { %1295 = vrot.lane.b32.xlu1 %v2263_v29, %s1988_s10  ;;  %1047 = vrot.lane.b32.xlu2 %v2263_v29, %s1990_s12 }
 0x153   : > { %1237 = vrot.lane.b32.xlu0 %v2289_v39, %s1987_s23 }
 0x154   : > { %v1286_v43 = vpop.permute.xlu1 %1285  ;;  %v2303_v44 = vpop.permute.xlu2 %856 }
 0x155   : > { %v1306_v45 = vsel %vm1299_vm0, %v2275_v32, %v1286_v43  ;;  %v2308_v46 = vpop.permute.xlu0 %854 }
 0x156   : > { %v1327_v47 = vmul.f32 %v1311_v42, %v1306_v45  ;;  %v1064_v42 = vperm.slane %v2389_v22, 1  ;;  %v2403_v45 = vld [vmem:[#allocation8 + $0x8] sm:$0xff] }
 0x158   : > { %1433 = vmatpush.msra.mxu0 %v1327_v47 }
 0x15a   : > { %987 = vrot.lane.b32.xlu1 %v2263_v29, %s1992_s15  ;;  %1297 = vrot.lane.b32.xlu2 %v2289_v39, %s1988_s10  ;;  %s1614_s10 = scalar_lea.hbm %s2760_s5, %s1735_s29 }
 0x15b   : > { %1117 = vrot.lane.b32.xlu0 %v2289_v39, %s1986_s26 }
 0x15c   : > { %v1166_v52 = vpop.permute.xlu1 %1165  ;;  %v2325_v53 = vpop.permute.xlu2 %979 }
 0x15d   : > { %v1226_v55 = vpop.permute.xlu0 %1225  ;;  %v1186_v56 = vsel %vm1179_vm1, %v2287_v38, %v1166_v52 }
 0x15e   : > { %v1246_v57 = vsel %vm1239_vm2, %v2243_v23, %v1226_v55  ;;  %v1207_v63 = vmul.f32 %v1191_v54, %v1186_v56  ;;  %v944_v54 = vperm.slane %v2403_v45, 1  ;;  %v938_v56 = vsel %vm931_vm6, %v2283_v36, %v2285_v37 }
 0x15f   : > { %v1267_v61 = vmul.f32 %v1251_v50, %v1246_v57  ;;  %v1004_v50 = vperm.slane %v2396_v34, 1 }
 0x161   : > { %1434 = vmatpush.msra.mxu0 %v1267_v61 }
 0x162   : > { %1177 = vrot.lane.b32.xlu1 %v2289_v39, %s1991_s13  ;;  %866 = vrot.lane.b32.xlu2 %v2263_v29, %s1993_s16 }
 0x163   : > { %1049 = vrot.lane.b32.xlu0 %v2289_v39, %s1990_s12  ;;  %1435 = vmatpush.msra.mxu0 %v1207_v63 }
 0x164   : > { %v2346_v1 = vpop.permute.xlu1 %977  ;;  %v2348_v2 = vpop.permute.xlu2 %1229 }
 0x165   : > { %1436 = vmatpush.msra.mxu0 %v1147_v0  ;;  %v2350_v3 = vpop.permute.xlu0 %1037  ;;  %v879_v0 = vsel %vm872_vm7, %v2308_v46, %v2303_v44 }
 0x166   : > { %v1058_v47 = vsel %vm1051_vm4, %v2253_v25, %v2350_v3 }
 0x167   : > { %1437 = vmatpush.msra.mxu0 %v2161_v10 }
 0x16a   : > { %868 = vrot.lane.b32.xlu1 %v2289_v39, %s1993_s16  ;;  %929 = vrot.lane.b32.xlu2 %v2289_v39, %s1989_s11 }
 0x16b   : > { %989 = vrot.lane.b32.xlu0 %v2289_v39, %s1992_s15 }
 0x16c   : > { %v2360_v5 = vpop.permute.xlu1 %1227  ;;  %v2362_v6 = vpop.permute.xlu2 %1041 }
 0x16d   : > { %v2365_v8 = vpop.permute.xlu0 %1287  ;;  %v1245_v9 = vsel %vm1239_vm2, %v1226_v55, %v2360_v5  ;;  %v1080_v55 = vmul.f32 %v1064_v42, %v1058_v47 }
 0x16e   : > { %v1305_v10 = vsel %vm1299_vm0, %v1286_v43, %v2365_v8  ;;  %v1268_v59 = vmul.f32 %v1252_v7, %v1245_v9 }
 0x16f   : > { %v1328_v58 = vmul.f32 %v1312_v4, %v1305_v10  ;;  %v960_v4 = vmul.f32 %v944_v54, %v938_v56  ;;  %v1133_v54 = vperm.slane %v2323_v51, 2 }
 0x171   : > { %1453 = vmatpush.msra.mxu1 %v1328_v58 }
 0x172   : > { %983 = vrot.lane.b32.xlu1 %v2223_v20, %s1992_s15  ;;  %923 = vrot.lane.b32.xlu2 %v2223_v20, %s1989_s11  ;;  %s1616_s11 = sshll.u32 %s275_s9, 4  ;;  %s1617_s11 = int_to_ptr.vmem [resolvable:$true] %s1616_s11 }
 0x173   : > { %1043 = vrot.lane.b32.xlu0 %v2223_v20, %s1990_s12  ;;  %1454 = vmatpush.msra.mxu1 %v1268_v59  ;;  %v1313_v59 = vperm.slane %v2291_v40, 2  ;;  %s1618_s12 = sshll.u32 %s1614_s10, 4  ;;  %s1619_s12 = int_to_ptr.hbm [resolvable:$true] %s1618_s12 }
 0x174   : > { %v2380_v13 = vpop.permute.xlu1 %1039  ;;  %v2382_v15 = vpop.permute.xlu2 %1231  ;;  %s1922_s13 = sshra.s32 %s1619_s12, 4  ;;  %s1923_s13 = int_to_ptr.hbm [resolvable:$true] %s1922_s13 }
 0x175   : > { %v1168_v16 = vpop.permute.xlu0 %1167  ;;  %s1924_s15 = scalar_lea.hbm %s1923_s13, 64  ;;  %p1929_p12 = scmp.lt.s32.totalorder %s1923_s13, %s2760_s5 }
 0x176   : > { %v1185_v18 = vsel %vm1179_vm1, %v1166_v52, %v1168_v16  ;;  %v2411_v52 = vld [vmem:[#allocation8] sm:$0xff]  ;;  %p1925_p1 = scmp.ne.s32.totalorder %s1923_s13, %s1924_s15  ;;  %p1930_p7 = scmp.lt.s32.totalorder %s1928_s6, %s1924_s15 }
 0x177   : > { %v1208_v19 = vmul.f32 %v1192_v12, %v1185_v18  ;;  %v884_v61 = vperm.slane %v2411_v52, 1 }
 0x178   : > { %p1926_p3 = pnand %p1925_p1, %p2094_p4  ;;  %p1931_p8 = por %p1930_p7, %p1929_p12 }
 0x179   : > { %1455 = vmatpush.msra.mxu1 %v1208_v19  ;;  %v1253_v19 = vperm.slane %v2310_v48, 2 }
 0x17a   : > { %p1927_p5 = pneg %p1926_p3 }
 0x17b   : > { %862 = vrot.lane.b32.xlu0 %v2223_v20, %s1993_s16 }
 0x17c   : > { %v2391_v26 = vpop.permute.xlu1 %1169  ;;  %v2393_v27 = vpop.permute.xlu2 %1171  ;;  %p1932_p9 = pnand %p1931_p8, %p1927_p5 }
 0x17d   : > { %v1108_v33 = vpop.permute.xlu0 %1107 }
 0x17e   : > { %v1125_v35 = vsel %vm1119_vm3, %v2273_v31, %v1108_v33  ;;  %v998_v31 = vsel %vm991_vm5, %v2261_v28, %v2346_v1 }
 0x17f   : > { %v1148_v43 = vmul.f32 %v1132_v21, %v1125_v35  ;;  %v1020_v62 = vmul.f32 %v1004_v50, %v998_v31  ;;  %v1244_v35 = vsel %vm1239_vm2, %v2360_v5, %v2348_v2  ;;  %v1184_v50 = vsel %vm1179_vm1, %v1168_v16, %v2391_v26 }
 0x180   : > { %v1269_v31 = vmul.f32 %v1253_v19, %v1244_v35  ;;  %v1314_v5 = vperm.slane %v2291_v40, 3  ;;  %v1243_v16 = vsel %vm1239_vm2, %v2348_v2, %v2382_v15  ;;  %v1194_v19 = vperm.slane %v2316_v49, 3 }
 0x181   : > { %1456 = vmatpush.msra.mxu1 %v1148_v43  ;;  %v1193_v43 = vperm.slane %v2316_v49, 2  ;;  %v1183_v2 = vsel %vm1179_vm1, %v2391_v26, %v2393_v27 }
 0x183   : > { %1457 = vmatpush.msra.mxu1 %v2175_v11  ;;  %v900_v11 = vmul.f32 %v884_v61, %v879_v0  ;;  %v1209_v56 = vmul.f32 %v1193_v43, %v1184_v50  ;;  %v1065_v0 = vperm.slane %v2389_v22, 2 }
 0x184   : > { %v1110_v57 = vpop.permute.xlu1 %1109  ;;  %v1112_v60 = vpop.permute.xlu2 %1111 }
 0x185   : > { %1458 = vmatpush.msra.mxu1 %v1080_v55  ;;  %v2425_v63 = vpop.permute.xlu0 %919  ;;  %v1124_v55 = vsel %vm1119_vm3, %v1108_v33, %v1110_v57  ;;  %v1123_v50 = vsel %vm1119_vm3, %v1110_v57, %v1112_v60 }
 0x186   : > { %v937_v26 = vsel %vm931_vm6, %v2285_v37, %v2425_v63  ;;  %v1056_v37 = vsel %vm1051_vm4, %v2380_v13, %v2362_v6 }
 0x187   : > { %1459 = vmatpush.msra.mxu1 %v1020_v62 }
 0x189   : > { %1460 = vmatpush.msra.mxu1 %v960_v4  ;;  %v1149_v4 = vmul.f32 %v1133_v54, %v1124_v55  ;;  %v1210_v54 = vmul.f32 %v1194_v19, %v1183_v2  ;;  %v885_v55 = vperm.slane %v2411_v52, 2 }
 0x18b   : > { %1461 = vmatpush.msra.mxu1 %v900_v11 }
 0x18c   : > { %v2431_v7 = vpop.permute.xlu1 %921  ;;  %v2433_v9 = vpop.permute.xlu2 %1113 }
 0x18d   : > { %v2438_v10 = vsel %vm1119_vm3, %v1112_v60, %v2433_v9  ;;  %v2440_v58 = vpop.permute.xlu0 %858  ;;  %v936_v19 = vsel %vm931_vm6, %v2425_v63, %v2431_v7  ;;  %v1318_v63 = vperm.slane %v2291_v40, 7 }
 0x18e   : > { %v878_v57 = vsel %vm872_vm7, %v2303_v44, %v2440_v58 }
 0x18f   : > { %v901_v44 = vmul.f32 %v885_v55, %v878_v57  ;;  %v1317_v55 = vperm.slane %v2291_v40, 6  ;;  %v1258_v57 = vperm.slane %v2310_v48, 7 }
 0x194   : > { %v2443_v12 = vpop.permute.xlu1 %860  ;;  %v2445_v18 = vpop.permute.xlu2 %925 }
 0x195   : > { %v1290_v21 = vpop.permute.xlu0 %1289 }
 0x196   : > { %v1304_v42 = vsel %vm1299_vm0, %v2365_v8, %v1290_v21  ;;  %v1254_v8 = vperm.slane %v2310_v48, 3 }
 0x197   : > { %v1329_v47 = vmul.f32 %v1313_v59, %v1304_v42  ;;  %v1057_v59 = vsel %vm1051_vm4, %v2350_v3, %v2380_v13  ;;  %v1005_v42 = vperm.slane %v2396_v34, 2  ;;  %v946_v13 = vperm.slane %v2403_v45, 3 }
 0x198   : > { %v1270_v43 = vmul.f32 %v1254_v8, %v1243_v16  ;;  %v1081_v3 = vmul.f32 %v1065_v0, %v1057_v59  ;;  %v1006_v16 = vperm.slane %v2396_v34, 3 }
 0x199   : > { %1473 = vmatpush.msra.mxu2 %v1329_v47  ;;  %v1134_v47 = vperm.slane %v2323_v51, 3 }
 0x19b   : > { %1474 = vmatpush.msra.mxu2 %v1269_v31  ;;  %v945_v31 = vperm.slane %v2403_v45, 2 }
 0x19c   : > { %v2464_v61 = vpop.permute.xlu1 %1291  ;;  %v2466_v62 = vpop.permute.xlu2 %1235 }
 0x19d   : > { %v1303_v33 = vsel %vm1299_vm0, %v1290_v21, %v2464_v61  ;;  %1475 = vmatpush.msra.mxu2 %v1209_v56  ;;  %v2476_v11 = vpop.permute.xlu0 %981  ;;  %v997_v21 = vsel %vm991_vm5, %v2346_v1, %v2325_v53  ;;  %v1150_v56 = vmul.f32 %v1134_v47, %v1123_v50  ;;  %v961_v8 = vmul.f32 %v945_v31, %v937_v26 }
 0x19e   : > { %v1330_v35 = vmul.f32 %v1314_v5, %v1303_v33  ;;  %v1021_v1 = vmul.f32 %v1005_v42, %v997_v21  ;;  %v1066_v5 = vperm.slane %v2389_v22, 3  ;;  %v996_v33 = vsel %vm991_vm5, %v2325_v53, %v2476_v11 }
 0x19f   : > { %1476 = vmatpush.msra.mxu2 %v1149_v4  ;;  %v877_v53 = vsel %vm872_vm7, %v2440_v58, %v2443_v12  ;;  %v962_v42 = vmul.f32 %v946_v13, %v936_v19 }
 0x1a0   : > { %1493 = vmatpush.msra.mxu3 %v1330_v35  ;;  %v1082_v59 = vmul.f32 %v1066_v5, %v1056_v37  ;;  %v1022_v35 = vmul.f32 %v1006_v16, %v996_v33  ;;  %v1256_v5 = vperm.slane %v2310_v48, 5  ;;  %v1257_v16 = vperm.slane %v2310_v48, 6 }
 0x1a1   : > { %1477 = vmatpush.msra.mxu2 %v2195_v14  ;;  %v1196_v33 = vperm.slane %v2316_v49, 5 }
 0x1a2   : > { %1494 = vmatpush.msra.mxu3 %v1270_v43 }
 0x1a3   : > { %1478 = vmatpush.msra.mxu2 %v1081_v3 }
 0x1a4   : > { %v2507_v14 = vpop.permute.xlu1 %1293  ;;  %v2509_v60 = vpop.permute.xlu2 %1115  ;;  %1495 = vmatpush.msra.mxu3 %v1210_v54 }
 0x1a5   : > { %1479 = vmatpush.msra.mxu2 %v1021_v1  ;;  %v1174_v0 = vpop.permute.xlu0 %1173  ;;  %v1316_v1 = vperm.slane %v2291_v40, 5 }
 0x1a6   : > { %v2519_v4 = vsel %vm1179_vm1, %v2393_v27, %v1174_v0  ;;  %1496 = vmatpush.msra.mxu3 %v1150_v56  ;;  %v886_v27 = vperm.slane %v2411_v52, 3 }
 0x1a7   : > { %1480 = vmatpush.msra.mxu2 %v961_v8 }
 0x1a8   : > { %1497 = vmatpush.msra.mxu3 %v2209_v17  ;;  %v902_v43 = vmul.f32 %v886_v27, %v877_v53  ;;  %v1136_v53 = vperm.slane %v2323_v51, 5 }
 0x1a9   : > { %1481 = vmatpush.msra.mxu2 %v901_v44 }
 0x1aa   : > { %1498 = vmatpush.msra.mxu3 %v1082_v59 }
 0x1ac   : > { %v2536_v2 = vpop.permute.xlu1 %1233  ;;  %v2538_v21 = vpop.permute.xlu2 %1047  ;;  %1499 = vmatpush.msra.mxu3 %v1022_v35 }
 0x1ad   : > { %v2540_v17 = vpop.permute.xlu0 %985 }
 0x1ae   : > { %1500 = vmatpush.msra.mxu3 %v962_v42 }
 0x1b0   : > { %1501 = vmatpush.msra.mxu3 %v902_v43 }
 0x1b4   : > { %v2543_v47 = vpop.permute.xlu1 %1045  ;;  %v1298_v3 = vpop.permute.xlu2 %1297 }
 0x1b5   : > { %v1307_v58 = vsel %vm1299_vm0, %v1298_v3, %v2275_v32  ;;  %v1176_v50 = vpop.permute.xlu0 %1175  ;;  %v1241_v32 = vsel %vm1239_vm2, %v2536_v2, %v2466_v62 }
 0x1b6   : > { %v1334_v31 = vmul.f32 %v1318_v63, %v1307_v58  ;;  %v1181_v19 = vsel %vm1179_vm1, %v1174_v0, %v1176_v50  ;;  %v1272_v42 = vmul.f32 %v1256_v5, %v1241_v32  ;;  %v2579_v63 = vld [vmem:[%s2757_s2] sm:$0xff]  ;;  %v1063_v5 = vperm.slane %v2389_v22, 0 }
 0x1b7   : > { %1723 = vmatmul.msk.f32.vlgmr.msra.gmra.mxu2 %vm1422_vm8, %v2579_v63  ;;  %1724 = vmatmul.msk.f32.vlgmr.msra.gmra.mxu3 %vm1422_vm8, %v2579_v63 }
 0x1b8   : > { %1573 = vmatpush.msrb.mxu3 %v1334_v31  ;;  %1722 = vmatmul.msk.f32.vlgmr.msra.gmra.mxu1 %vm1422_vm8, %v2579_v63 }
 0x1bc   : > { %v2548_v54 = vpop.permute.xlu1 %864 }
 0x1bd   : > { %v2550_v26 = vpop.permute.xlu0 %927 }
 0x1c4   : > { %v1296_v56 = vpop.permute.xlu1 %1295 }
 0x1c5   : > { %v1300_v37 = vsel %vm1299_vm0, %v1296_v56, %v1298_v3  ;;  %v1301_v8 = vsel %vm1299_vm0, %v2507_v14, %v1296_v56  ;;  %v1238_v44 = vpop.permute.xlu0 %1237  ;;  %v1137_v56 = vperm.slane %v2323_v51, 6 }
 0x1c6   : > { %v1332_v59 = vmul.f32 %v1316_v1, %v1301_v8  ;;  %v1333_v13 = vmul.f32 %v1317_v55, %v1300_v37  ;;  %v1240_v27 = vsel %vm1239_vm2, %v2466_v62, %v1238_v44  ;;  %v1247_v35 = vsel %vm1239_vm2, %v1238_v44, %v2243_v23 }
 0x1c7   : > { %v1274_v43 = vmul.f32 %v1258_v57, %v1247_v35  ;;  %v1121_v62 = vsel %vm1119_vm3, %v2433_v9, %v2509_v60  ;;  %v1273_v0 = vmul.f32 %v1257_v16, %v1240_v27  ;;  %v1212_v23 = vmul.f32 %v1196_v33, %v1181_v19  ;;  %v2591_v9 = vpop.permute.xlu2 %866 }
 0x1c8   : > { %1533 = vmatpush.msrb.mxu1 %v1332_v59  ;;  %1553 = vmatpush.msrb.mxu2 %v1333_v13  ;;  %v1152_v3 = vmul.f32 %v1136_v53, %v1121_v62  ;;  %v1197_v1 = vperm.slane %v2316_v49, 6  ;;  %v1198_v55 = vperm.slane %v2316_v49, 7  ;;  %v1138_v57 = vperm.slane %v2323_v51, 7 }
 0x1c9   : > { %1574 = vmatpush.msrb.mxu3 %v1274_v43  ;;  %v889_v62 = vperm.slane %v2411_v52, 6 }
 0x1ca   : > { %1534 = vmatpush.msrb.mxu1 %v1272_v42  ;;  %1554 = vmatpush.msrb.mxu2 %v1273_v0  ;;  %v1009_v42 = vperm.slane %v2396_v34, 6 }
 0x1cc   : > { %v988_v58 = vpop.permute.xlu1 %987  ;;  %1535 = vmatpush.msrb.mxu1 %v1212_v23  ;;  %v1003_v23 = vperm.slane %v2396_v34, 0 }
 0x1cd   : > { %v1118_v31 = vpop.permute.xlu0 %1117  ;;  %v993_v0 = vsel %vm991_vm5, %v2540_v17, %v988_v58 }
 0x1ce   : > { %1536 = vmatpush.msrb.mxu1 %v1152_v3  ;;  %v1120_v37 = vsel %vm1119_vm3, %v2509_v60, %v1118_v31  ;;  %v1127_v8 = vsel %vm1119_vm3, %v1118_v31, %v2271_v30  ;;  %v1069_v60 = vperm.slane %v2389_v22, 6  ;;  %v1416_v30 = vld [vmem:[%s2759_s4] sm:$0xff]  ;;  %v1010_v3 = vperm.slane %v2396_v34, 7 }
 0x1cf   : > { %v1153_v27 = vmul.f32 %v1137_v56, %v1120_v37  ;;  %v1154_v35 = vmul.f32 %v1138_v57, %v1127_v8  ;;  %v930_v53 = vpop.permute.xlu2 %929  ;;  %v933_v56 = vsel %vm931_vm6, %v2445_v18, %v2550_v26  ;;  %v883_v37 = vperm.slane %v2411_v52, 0 }
 0x1d0   : > { %1537 = vmatpush.msrb.mxu1 %v2245_v24  ;;  %v932_v57 = vsel %vm931_vm6, %v2550_v26, %v930_v53  ;;  %v874_v26 = vsel %vm872_vm7, %v2548_v54, %v2591_v9 }
 0x1d4   : > { %v1178_v32 = vpop.permute.xlu1 %1177 }
 0x1d5   : > { %v1180_v24 = vsel %vm1179_vm1, %v1176_v50, %v1178_v32  ;;  %v1187_v16 = vsel %vm1179_vm1, %v1178_v32, %v2287_v38  ;;  %v1050_v44 = vpop.permute.xlu0 %1049  ;;  %v1053_v38 = vsel %vm1051_vm4, %v2543_v47, %v2538_v21  ;;  %v1070_v50 = vperm.slane %v2389_v22, 7 }
 0x1d6   : > { %v1213_v33 = vmul.f32 %v1197_v1, %v1180_v24  ;;  %v1214_v59 = vmul.f32 %v1198_v55, %v1187_v16  ;;  %v1059_v13 = vsel %vm1051_vm4, %v1050_v44, %v2253_v25  ;;  %v1994_v25 = vmov 0  }
 0x1d7   : > { %v1079_v19 = vmul.f32 %v1063_v5, %v1059_v13  ;;  %1816 = vset.pattern.permute.xlu1 %v1994_v25  ;;  %v1052_v43 = vsel %vm1051_vm4, %v2538_v21, %v1050_v44  ;;  %1817 = vset.pattern.permute.xlu0 %v1994_v25  ;;  %v1085_v31 = vmul.f32 %v1069_v60, %v1053_v38  ;;  %v949_v1 = vperm.slane %v2403_v45, 6  ;;  %v924_v25 = vpop.permute.xlu2 %923 }
 0x1d8   : > { %1555 = vmatpush.msrb.mxu2 %v1213_v33  ;;  %1575 = vmatpush.msrb.mxu3 %v1214_v59  ;;  %v943_v55 = vperm.slane %v2403_v45, 0  ;;  %v950_v21 = vperm.slane %v2403_v45, 7  ;;  %v1086_v32 = vmul.f32 %v1070_v50, %v1052_v43  ;;  %v939_v24 = vsel %vm931_vm6, %v930_v53, %v2283_v36 }
 0x1d9   : > { %1438 = vmatpush.msra.mxu0 %v1079_v19  ;;  %1419 = vperm.xlu1 %1816, %v1416_v30   ;;  %v890_v44 = vperm.slane %v2411_v52, 7  ;;  %v1315_v36 = vperm.slane %v2291_v40, 4  ;;  %v965_v13 = vmul.f32 %v949_v1, %v933_v56  ;;  %v1302_v19 = vsel %vm1299_vm0, %v2464_v61, %v2507_v14 }
 0x1da   : > { %1556 = vmatpush.msrb.mxu2 %v1153_v27  ;;  %1576 = vmatpush.msrb.mxu3 %v1154_v35  ;;  %v959_v60 = vmul.f32 %v943_v55, %v939_v24  ;;  %v966_v27 = vmul.f32 %v950_v21, %v932_v57  ;;  %v1255_v40 = vperm.slane %v2310_v48, 4  ;;  %v905_v35 = vmul.f32 %v889_v62, %v874_v26 }
 0x1db   : > { %v1068_v38 = vperm.slane %v2389_v22, 5  ;;  %v1331_v61 = vmul.f32 %v1315_v36, %v1302_v19  ;;  %v1195_v14 = vperm.slane %v2316_v49, 4  ;;  %v1008_v48 = vperm.slane %v2396_v34, 5 }
 0x1dc   : > { %v869_v5 = vpop.permute.xlu1 %868  ;;  %1557 = vmatpush.msrb.mxu2 %v2263_v29  ;;  %1577 = vmatpush.msrb.mxu3 %v2289_v39  ;;  %v1025_v29 = vmul.f32 %v1009_v42, %v993_v0  ;;  %v1135_v42 = vperm.slane %v2323_v51, 4  ;;  %v948_v49 = vperm.slane %v2403_v45, 5 }
 0x1dd   : > { %v990_v8 = vpop.permute.xlu0 %989  ;;  %v1211_v51 = vmul.f32 %v1195_v14, %v2519_v4 }
 0x1de   : > { %v992_v39 = vsel %vm991_vm5, %v988_v58, %v990_v8  ;;  %v999_v16 = vsel %vm991_vm5, %v990_v8, %v2261_v28  ;;  %1558 = vmatpush.msrb.mxu2 %v1085_v31  ;;  %1578 = vmatpush.msrb.mxu3 %v1086_v32  ;;  %v873_v58 = vsel %vm872_vm7, %v2591_v9, %v869_v5  ;;  %v888_v31 = vperm.slane %v2411_v52, 5 }
 0x1df   : > { %v1019_v33 = vmul.f32 %v1003_v23, %v999_v16  ;;  %v1026_v59 = vmul.f32 %v1010_v3, %v992_v39  ;;  %v880_v28 = vsel %vm872_vm7, %v869_v5, %v2308_v46  ;;  %v1242_v9 = vsel %vm1239_vm2, %v2382_v15, %v2536_v2 }
 0x1e0   : > { %1559 = vmatpush.msrb.mxu2 %v1025_v29  ;;  %v899_v46 = vmul.f32 %v883_v37, %v880_v28  ;;  %v906_v30 = vmul.f32 %v890_v44, %v873_v58  ;;  %v1271_v15 = vmul.f32 %v1255_v40, %v1242_v9  ;;  %v1151_v0 = vmul.f32 %v1135_v42, %v2438_v10 }
 0x1e1   : > { %1439 = vmatpush.msra.mxu0 %v1019_v33  ;;  %1579 = vmatpush.msrb.mxu3 %v1026_v59  ;;  %v1067_v23 = vperm.slane %v2389_v22, 4  ;;  %v947_v22 = vperm.slane %v2403_v45, 4 }
 0x1e2   : > { %1560 = vmatpush.msrb.mxu2 %v965_v13 }
 0x1e3   : > { %1440 = vmatpush.msra.mxu0 %v959_v60  ;;  %1580 = vmatpush.msrb.mxu3 %v966_v27 }
 0x1e4   : > { %v984_v50 = vpop.permute.xlu1 %983  ;;  %1561 = vmatpush.msrb.mxu2 %v905_v35 }
 0x1e5   : > { %1441 = vmatpush.msra.mxu0 %v899_v46  ;;  %1581 = vmatpush.msrb.mxu3 %v906_v30  ;;  %v1044_v53 = vpop.permute.xlu0 %1043  ;;  %v994_v2 = vsel %vm991_vm5, %v984_v50, %v2540_v17  ;;  %v934_v17 = vsel %vm931_vm6, %v924_v25, %v2445_v18  ;;  %v1007_v18 = vperm.slane %v2396_v34, 4  ;;  %v995_v1 = vsel %vm991_vm5, %v2476_v11, %v984_v50 }
 0x1e6   : > { %v1054_v43 = vsel %vm1051_vm4, %v1044_v53, %v2543_v47  ;;  %1721 = vmatmul.msk.f32.vlgmr.msra.gmra.mxu0 %vm1422_vm8, %v2579_v63  ;;  %1727 = vmatmul.msk.f32.vlgmr.msrb.gmra.mxu2 %vm1422_vm8, %v2579_v63  ;;  %v1024_v47 = vmul.f32 %v1008_v48, %v994_v2  ;;  %v964_v3 = vmul.f32 %v948_v49, %v934_v17  ;;  %v887_v11 = vperm.slane %v2411_v52, 4 }
 0x1e7   : > { %1513 = vmatpush.msrb.mxu0 %v1331_v61  ;;  %v1084_v62 = vmul.f32 %v1068_v38, %v1054_v43  ;;  %1728 = vmatmul.msk.f32.vlgmr.msrb.gmra.mxu3 %vm1422_vm8, %v2579_v63  ;;  %v1055_v4 = vsel %vm1051_vm4, %v2362_v6, %v1044_v53  ;;  %v935_v6 = vsel %vm931_vm6, %v2431_v7, %v924_v25 }
 0x1e8   : > { %v1083_v55 = vmul.f32 %v1067_v23, %v1055_v4  ;;  %v1023_v5 = vmul.f32 %v1007_v18, %v995_v1  ;;  %v963_v56 = vmul.f32 %v947_v22, %v935_v6 }
 0x1e9   : > { %1514 = vmatpush.msrb.mxu0 %v1271_v15  ;;  %1538 = vmatpush.msrb.mxu1 %v1084_v62 }
 0x1eb   : > { %1515 = vmatpush.msrb.mxu0 %v1211_v51  ;;  %1539 = vmatpush.msrb.mxu1 %v1024_v47 }
 0x1ed   : > { %1516 = vmatpush.msrb.mxu0 %v1151_v0  ;;  %1540 = vmatpush.msrb.mxu1 %v964_v3  ;;  %v863_v10 = vpop.permute.xlu0 %862 }
 0x1ee   : > { %v875_v21 = vsel %vm872_vm7, %v863_v10, %v2548_v54  ;;  %v876_v45 = vsel %vm872_vm7, %v2443_v12, %v863_v10 }
 0x1ef   : > { %1517 = vmatpush.msrb.mxu0 %v2223_v20  ;;  %v904_v34 = vmul.f32 %v888_v31, %v875_v21  ;;  %v903_v20 = vmul.f32 %v887_v11, %v876_v45 }
 0x1f1   : > { %1518 = vmatpush.msrb.mxu0 %v1083_v55  ;;  %1541 = vmatpush.msrb.mxu1 %v904_v34 }
 0x1f2   : > { %1726 = vmatmul.msk.f32.vlgmr.msrb.gmra.mxu1 %vm1422_vm8, %v2579_v63 }
 0x1f3   : > { %1519 = vmatpush.msrb.mxu0 %v1023_v5 }
 0x1f5   : > { %1520 = vmatpush.msrb.mxu0 %v963_v56 }
 0x1f7   : > { %1521 = vmatpush.msrb.mxu0 %v903_v20 }
 0x1f8   : > { %1725 = vmatmul.msk.f32.vlgmr.msrb.gmra.mxu0 %vm1422_vm8, %v2579_v63 }
 0x235   : > { %v1463_v7 = vpop.f32.mrf.mxu1 }
 0x23a   : > { %v1483_v52 = vpop.f32.mrf.mxu2  ;;  %v1503_v54 = vpop.f32.mrf.mxu3 }
 0x24b   : > { %v1420_v57 = vpop.permute.xlu1 %1419 }
 0x24c   : > { %v1464_v32 = vadd.f32 %v1463_v7, %v1420_v57  ;;  %v1484_v41 = vadd.f32 %v1483_v52, %v1420_v57  ;;  %v1504_v12 = vadd.f32 %v1503_v54, %v1420_v57 }
 0x24e   : > { %v1587_v37 = vmax.f32 %v1464_v32, 0.0  ;;  %v1588_v8 = vmax.f32 %v1484_v41, 0.0  ;;  %v1589_v24 = vmax.f32 %v1504_v12, 0.0 }
 0x250   : > { %1595 = vst [vmem:[%s275_s9 + $0x8] sm:$0xff] %v1587_v37 }
 0x251   : > { %1596 = vst [vmem:[%s275_s9 + $0x10] sm:$0xff] %v1588_v8 }
 0x252   : > { %1597 = vst [vmem:[%s275_s9 + $0x18] sm:$0xff] %v1589_v24 }
 0x263   : > { %v1443_v29 = vpop.f32.mrf.mxu0 }
 0x264   : > { %v1444_v39 = vadd.f32 %v1443_v29, %v1420_v57 }
 0x266   : > { %v1586_v16 = vmax.f32 %v1444_v39, 0.0 }
 0x268   : > { %1594 = vst [vmem:[%s275_s9] sm:$0xff] %v1586_v16 }
 0x269   : > { %v1563_v63 = vpop.f32.mrf.mxu2 }
 0x26a   : > { %v1564_v26 = vadd.f32 %v1563_v63, %v1420_v57  ;;  %v1583_v44 = vpop.f32.mrf.mxu3 }
 0x26b   : > { %v1584_v33 = vadd.f32 %v1583_v44, %v1420_v57 }
 0x26c   : > { %v1592_v59 = vmax.f32 %v1564_v26, 0.0 }
 0x26d   : > { %v1593_v36 = vmax.f32 %v1584_v33, 0.0 }
 0x26e   : > { %1600 = vst [vmem:[%s275_s9 + $0x30] sm:$0xff] %v1592_v59 }
 0x26f   : > { %v1543_v13 = vpop.f32.mrf.mxu1  ;;  %1601 = vst [vmem:[%s275_s9 + $0x38] sm:$0xff] %v1593_v36 }
 0x270   : > { %v1544_v58 = vadd.f32 %v1543_v13, %v1420_v57 }
 0x272   : > { %v1591_v28 = vmax.f32 %v1544_v58, 0.0 }
 0x274   : > { %1599 = vst [vmem:[%s275_s9 + $0x28] sm:$0xff] %v1591_v28 }
 0x275   : > { %v1523_v19 = vpop.f32.mrf.mxu0 }
 0x276   : > { %v1524_v60 = vadd.f32 %v1523_v19, %v1420_v57 }
 0x278   : > { %v1590_v27 = vmax.f32 %v1524_v60, 0.0 }
 0x27a   : > { %1598 = vst [vmem:[%s275_s9 + $0x20] sm:$0xff] %v1590_v27 }
 0x27b   : > { %1935 = shalt.err (!%p1932_p9)
}
 0x27c   : > { %1746 = dma.vmem_to_hbm [thread:$0]  (%p2094_p4), %s1617_s11, 1024, %s1619_s12, %s1603_s25  }
 0x27d PF: > { %s1630_s24 = sand.u32 1, %s1966_s18   ;;  %p2767_p10 = scmp.ge.s32.totalorder %s1978_s21, 2 }
 0x27e   : > { %s1631_s8 = scalar_lea.sflag [#allocation5], %s1630_s24 }
 0x27f   : > { %p1760_p13 = pnand %p2767_p10, %p2098_p6 }
 0x281   : > { %p1761_p11 = pneg %p1760_p13 }
 0x283   : > { %1961 = dma.done.wait (%p1761_p11), %s1631_s8, 1024  }
 0x284   : > { %1963 = vsyncadd (%p1761_p11), %s1631_s8, 4294966272  ;;  %p19_p0 = scmp.ge.s32.totalorder %s2068_s14, 4   ;;  %s2768_s18 = smov %s1970_s19 }
 0x285   : > { %s2769_s19 = smov %s1974_s20  ;;  %s2770_s20 = smov %s2079_s17 }
 0x286   : > { %s2771_s21 = smov %s2068_s14  ;;  %21 = sbr.rel (!%p19_p0) target bundleno = 6 (0x6), region = 100 }
 0x28b   :  { %1637 = vsyncpa [#allocation4], 1 }
 0x28c   :  { %1639 = vsyncpa [#allocation4 + $0x1], 1 }
 0x28d   :  { %1640 = vsyncpa [#allocation7], 1 }
 0x28e   :  { %1641 = vsyncpa [#allocation5], 1 }
 0x28f   :  { %1643 = vsyncpa [#allocation5 + $0x1], 1 }

</bundles_post_ra>
